<compile_context>
chip_gen: v7x
topology: tpu7x:2x2x1
jax: 0.10.0
libtpu: 0.0.40
codegen_flags: <defaults>
</compile_context>

<pallas_src>
import functools
import math

import jax
import jax.numpy as jnp
from jax import lax
from jax.experimental import pallas as pl
from jax.experimental.pallas import tpu as pltpu

DIM_V = 128
NUM_HEADS = 4
DIM_SPLIT = DIM_V // NUM_HEADS  # 32
# head_scr reuse silently relies on the 4 static 32-lane slices exactly tiling DIM_V.
assert NUM_HEADS * DIM_SPLIT == DIM_V


def _mab_block(x2d, wqkv_ref, bqkv_ref, wo_ref, bo_ref, head_scr,
               b_blk, n, n_valid):
    """One MAB(bn=False) layer on a flattened (b_blk*n, d_in) block.

    MXU matmuls take bf16 operands with f32 accumulation; softmax / residual /
    ReLU math stays f32.  The 1/sqrt(dim_V) attention scale is pre-folded into
    the K projection weights on the host.
    """
    m = b_blk * n

    # Single fused QKV projection: (m, d_in) @ (d_in, 3*128) on the MXU.
    qkv = (jnp.dot(x2d.astype(jnp.bfloat16), wqkv_ref[...],
                   preferred_element_type=jnp.float32)
           + bqkv_ref[...])
    q = qkv[:, 0:DIM_V]                   # unscaled (used in the residual)
    k = qkv[:, DIM_V:2 * DIM_V]           # pre-scaled by 1/sqrt(dim_V)
    v = qkv[:, 2 * DIM_V:3 * DIM_V]

    for h in range(NUM_HEADS):            # static unroll over the 4 heads
        lo = h * DIM_SPLIT
        hi = lo + DIM_SPLIT
        qh = q[:, lo:hi].reshape(b_blk, n, DIM_SPLIT)
        kh = k[:, lo:hi].reshape(b_blk, n, DIM_SPLIT)
        vh = v[:, lo:hi].reshape(b_blk, n, DIM_SPLIT)

        # Batched q @ k^T without an explicit transpose (contract last dims).
        s = jnp.einsum('bnd,bmd->bnm',
                       qh.astype(jnp.bfloat16), kh.astype(jnp.bfloat16),
                       preferred_element_type=jnp.float32)     # (b_blk, n, n)
        if n_valid < n:  # static: mask padded key columns (sequence padding)
            col = lax.broadcasted_iota(jnp.int32, (1, 1, n), 2)
            s = jnp.where(col < n_valid, s, -1e30)
        s_max = jnp.max(s, axis=-1, keepdims=True)
        p = jnp.exp(s - s_max)
        inv = pl.reciprocal(jnp.sum(p, axis=-1, keepdims=True))  # exact
        av = jnp.einsum('bnm,bmd->bnd',
                        p.astype(jnp.bfloat16), vh.astype(jnp.bfloat16),
                        preferred_element_type=jnp.float32)
        # Write this head's (qh + softmax(s) @ vh) straight into its static
        # 32-lane slice of the 128-lane scratch (no lane-repacking concat).
        head_scr[:, lo:hi] = (qh + av * inv).reshape(m, DIM_SPLIT)

    o = head_scr[...]                                            # (m, 128) f32
    h_o = (jnp.dot(o.astype(jnp.bfloat16), wo_ref[...],
                   preferred_element_type=jnp.float32)
           + bo_ref[...])
    return o + jnp.maximum(h_o, 0.0)                             # o + relu(fc_o(o))


def _traj_enc_kernel(x_ref,
                     wqkv1_ref, bqkv1_ref, wo1_ref, bo1_ref,
                     wqkv2_ref, bqkv2_ref, wo2_ref, bo2_ref,
                     o_ref, head_scr, *, n_valid):
    b_blk, n, d_in = x_ref.shape
    m = b_blk * n
    x2d = x_ref[...].reshape(m, d_in)      # bf16 activations (cast on host)
    # Layer 1 (input_dim -> 128): result stays on-chip, no HBM round trip.
    o1 = _mab_block(x2d, wqkv1_ref, bqkv1_ref, wo1_ref, bo1_ref,
                    head_scr, b_blk, n, n_valid)
    # Layer 2 (128 -> 128), reusing the same head scratch buffer.
    o2 = _mab_block(o1, wqkv2_ref, bqkv2_ref, wo2_ref, bo2_ref,
                    head_scr, b_blk, n, n_valid)
    o_ref[...] = o2.reshape(b_blk, n, DIM_V)


def _choose_blocking(B, N):
    """Pick (b_blk, B_pad, N_pad).

    Target ~1024 flattened rows (b_blk*N_pad) per grid step so per-step
    pipeline overhead (~0.35us) is negligible and the 256-wide MXU is filled.
    The batch is padded to a multiple of b_blk (no divisor constraint on B).
    When B is small, split into 2 grid steps only if each step still gets
    >=256 rows (v7x megacore / DMA overlap without starving v5e/v6e).
    Live VMEM at m~1024 is only a few MiB: far under v7x's 32 MiB scoped limit.
    """
    n_pad = -(-N // 8) * 8                 # sublane-aligned sequence length
    target_rows = 1024
    b_blk = max(1, target_rows // n_pad)
    if b_blk >= B:
        b_blk = B
        if B >= 2 and B * n_pad >= 512:
            b_blk = -(-B // 2)
    b_pad = -(-B // b_blk) * b_blk
    return b_blk, b_pad, n_pad


def fuse_mab_params(params):
    """(wq,bq,wk,bk,wv,bv,wo,bo) -> (w_qkv, b_qkv, wo, bo).

    The 1/sqrt(dim_V) attention scale is folded into the K projection, and the
    weight matrices are cast to bf16 (the MXU is bf16-native on v5e/v6e/v7x);
    biases stay f32 (added after the f32 accumulation)."""
    wq, bq, wk, bk, wv, bv, wo, bo = params
    scale = 1.0 / math.sqrt(DIM_V)   # PyTorch divides by sqrt(dim_V), not head_dim
    w_qkv = jnp.concatenate([wq, wk * scale, wv], axis=1).astype(jnp.bfloat16)
    b_qkv = jnp.concatenate([bq, bk * scale, bv], axis=1).astype(jnp.float32)
    return w_qkv, b_qkv, wo.astype(jnp.bfloat16), bo.astype(jnp.float32)


@jax.jit
def trajectory_encoder(x, params1, params2):
    B, N, D_in = x.shape
    b_blk, b_pad, n_pad = _choose_blocking(B, N)
    grid = (b_pad // b_blk,)

    w_qkv1, b_qkv1, wo1, bo1 = fuse_mab_params(params1)
    w_qkv2, b_qkv2, wo2, bo2 = fuse_mab_params(params2)

    # Pad batch / sequence (padded key columns are masked inside the kernel;
    # padded batch rows are independent and simply sliced off) and cast the
    # activations to bf16 on the host so the input DMA is halved.
    x_p = jnp.pad(x, ((0, b_pad - B), (0, n_pad - N), (0, 0))).astype(jnp.bfloat16)

    m_total = b_pad * n_pad
    flops = (2 * m_total * D_in * 3 * DIM_V            # layer-1 fused QKV
             + 2 * m_total * DIM_V * 3 * DIM_V         # layer-2 fused QKV
             + 2 * 2 * m_total * DIM_V * DIM_V         # 2x fc_o
             + 2 * 2 * 2 * m_total * n_pad * DIM_V)    # 2 layers x (scores + AV)
    transcendentals = 2 * NUM_HEADS * b_pad * n_pad * n_pad
    bytes_accessed = (m_total * D_in * 2                # x in (bf16)
                      + m_total * DIM_V * 4             # out (f32)
                      + (D_in + DIM_V) * 3 * DIM_V * 2  # fused QKV weights (bf16)
                      + 2 * DIM_V * DIM_V * 2           # fc_o weights (bf16)
                      + (2 * 3 * DIM_V + 2 * DIM_V) * 4)  # biases (f32)

    # Grid-invariant weights/biases: resident in VMEM, single-buffered.
    const = lambda shape: pl.BlockSpec(shape, lambda i: (0, 0),
                                       pipeline_mode=pl.Buffered(1))

    kernel = functools.partial(_traj_enc_kernel, n_valid=N)

    out = pl.pallas_call(
        kernel,
        out_shape=jax.ShapeDtypeStruct((b_pad, n_pad, DIM_V), jnp.float32),
        grid_spec=pltpu.PrefetchScalarGridSpec(
            num_scalar_prefetch=0,
            grid=grid,
            in_specs=[
                pl.BlockSpec((b_blk, n_pad, D_in), lambda i: (i, 0, 0)),  # x block
                const((D_in, 3 * DIM_V)),   # W_qkv layer 1 (Wq|Wk*scale|Wv), bf16
                const((1, 3 * DIM_V)),      # b_qkv layer 1
                const((DIM_V, DIM_V)),      # W_o   layer 1, bf16
                const((1, DIM_V)),          # b_o   layer 1
                const((DIM_V, 3 * DIM_V)),  # W_qkv layer 2, bf16
                const((1, 3 * DIM_V)),      # b_qkv layer 2
                const((DIM_V, DIM_V)),      # W_o   layer 2, bf16
                const((1, DIM_V)),          # b_o   layer 2
            ],
            out_specs=pl.BlockSpec((b_blk, n_pad, DIM_V), lambda i: (i, 0, 0)),
            scratch_shapes=[pltpu.VMEM((b_blk * n_pad, DIM_V), jnp.float32)],
        ),
        compiler_params=pltpu.CompilerParams(
            dimension_semantics=("parallel",)),
        cost_estimate=pl.CostEstimate(flops=flops,
                                      transcendentals=transcendentals,
                                      bytes_accessed=bytes_accessed),
    )(x_p, w_qkv1, b_qkv1, wo1, bo1, w_qkv2, b_qkv2, wo2, bo2)

    return out[:B, :N]


def init_mab_params(key, dim_in, dim_v=DIM_V):
    ks = jax.random.split(key, 8)
    def lin(kw, kb, din, dout):
        bound = 1.0 / math.sqrt(din)
        w = jax.random.uniform(kw, (din, dout), jnp.float32, -bound, bound)
        b = jax.random.uniform(kb, (1, dout), jnp.float32, -bound, bound)
        return w, b
    wq, bq = lin(ks[0], ks[1], dim_in, dim_v)
    wk, bk = lin(ks[2], ks[3], dim_in, dim_v)
    wv, bv = lin(ks[4], ks[5], dim_in, dim_v)
    wo, bo = lin(ks[6], ks[7], dim_v, dim_v)
    return (wq, bq, wk, bk, wv, bv, wo, bo)


# ---------------- pure-JAX reference (for correctness check) ----------------
def _mab_ref(x, params):
    wq, bq, wk, bk, wv, bv, wo, bo = params
    q = x @ wq + bq
    k = x @ wk + bk
    v = x @ wv + bv
    # torch.cat(split(dim_split, 2), 0): (H*B, N, dim_split)
    qh = jnp.concatenate(jnp.split(q, NUM_HEADS, axis=2), axis=0)
    kh = jnp.concatenate(jnp.split(k, NUM_HEADS, axis=2), axis=0)
    vh = jnp.concatenate(jnp.split(v, NUM_HEADS, axis=2), axis=0)
    a = jax.nn.softmax(jnp.einsum('bnd,bmd->bnm', qh, kh) / math.sqrt(DIM_V), axis=2)
    o = qh + jnp.einsum('bnm,bmd->bnd', a, vh)
    o = jnp.concatenate(jnp.split(o, NUM_HEADS, axis=0), axis=2)  # (B, N, DIM_V)
    return o + jax.nn.relu(o @ wo + bo)


def trajectory_encoder_ref(x, params1, params2):
    return _mab_ref(_mab_ref(x, params1), params2)


if __name__ == "__main__":
    B, N, INPUT_DIM = 2, 8, 16

    key = jax.random.PRNGKey(0)
    kx, k1, k2 = jax.random.split(key, 3)
    x = jax.random.normal(kx, (B, N, INPUT_DIM), jnp.float32)
    params1 = init_mab_params(k1, INPUT_DIM)
    params2 = init_mab_params(k2, DIM_V)

    out = trajectory_encoder(x, params1, params2)
    out = jax.block_until_ready(out)
    assert out.shape == (B, N, DIM_V)

    ref = trajectory_encoder_ref(x, params1, params2)
    # bf16 MXU operands (f32 accumulate) across two stacked layers -> compare
    # with a scale-aware max-error check; real bugs would be O(1) off.
    err = float(jnp.max(jnp.abs(out - ref)) / (jnp.max(jnp.abs(ref)) + 1e-6))
    assert bool(jnp.all(jnp.isfinite(out)))
    assert err < 5e-2, f"mismatch vs reference: rel-max err {err}"

    print("KERNEL_OK")
</pallas_src>

<mosaic_0001>
module attributes {stable_mosaic.version = 11 : i64} {
  func.func @_traj_enc_kernel(%arg0: i32, %arg1: memref<2x8x16xbf16, #tpu.memory_space<vmem>>, %arg2: memref<16x384xbf16, #tpu.memory_space<vmem>>, %arg3: memref<1x384xf32, #tpu.memory_space<vmem>>, %arg4: memref<128x128xbf16, #tpu.memory_space<vmem>>, %arg5: memref<1x128xf32, #tpu.memory_space<vmem>>, %arg6: memref<128x384xbf16, #tpu.memory_space<vmem>>, %arg7: memref<1x384xf32, #tpu.memory_space<vmem>>, %arg8: memref<128x128xbf16, #tpu.memory_space<vmem>>, %arg9: memref<1x128xf32, #tpu.memory_space<vmem>>, %arg10: memref<2x8x128xf32, #tpu.memory_space<vmem>>, %arg11: memref<16x128xf32, #tpu.memory_space<vmem>>) attributes {dimension_semantics = [#tpu.dimension_semantics<parallel>], iteration_bounds = array<i64: 1>, scalar_prefetch = 0 : i64, scratch_operands = 1 : i64, tpu.core_type = #tpu.core_type<tc>, window_params = [{transform_indices = @transform_0, window_bounds = array<i64: 2, 8, 16>}, {pipeline_mode = #tpu.pipeline_mode<synchronous>, transform_indices = @transform_1, window_bounds = array<i64: 16, 384>}, {pipeline_mode = #tpu.pipeline_mode<synchronous>, transform_indices = @transform_2, window_bounds = array<i64: 1, 384>}, {pipeline_mode = #tpu.pipeline_mode<synchronous>, transform_indices = @transform_3, window_bounds = array<i64: 128, 128>}, {pipeline_mode = #tpu.pipeline_mode<synchronous>, transform_indices = @transform_4, window_bounds = array<i64: 1, 128>}, {pipeline_mode = #tpu.pipeline_mode<synchronous>, transform_indices = @transform_5, window_bounds = array<i64: 128, 384>}, {pipeline_mode = #tpu.pipeline_mode<synchronous>, transform_indices = @transform_6, window_bounds = array<i64: 1, 384>}, {pipeline_mode = #tpu.pipeline_mode<synchronous>, transform_indices = @transform_7, window_bounds = array<i64: 128, 128>}, {pipeline_mode = #tpu.pipeline_mode<synchronous>, transform_indices = @transform_8, window_bounds = array<i64: 1, 128>}, {transform_indices = @transform_9, window_bounds = array<i64: 2, 8, 128>}]} {
    %c0 = arith.constant 0 : index
    %c0_0 = arith.constant 0 : index
    %c0_1 = arith.constant 0 : index
    %0 = vector.load %arg1[%c0, %c0_0, %c0_1] : memref<2x8x16xbf16, #tpu.memory_space<vmem>>, vector<2x8x16xbf16>
    %1 = vector.shape_cast %0 : vector<2x8x16xbf16> to vector<16x16xbf16>
    %c0_2 = arith.constant 0 : index
    %c0_3 = arith.constant 0 : index
    %2 = vector.load %arg2[%c0_2, %c0_3] : memref<16x384xbf16, #tpu.memory_space<vmem>>, vector<16x384xbf16>
    %cst = arith.constant dense<0.000000e+00> : vector<16x384xf32>
    %3 = tpu.matmul %1, %2, %cst {dimension_numbers = #tpu.dot_dimension_numbers<[1], [0], [0], [1], [0, 0, 1, 1], [], []>} : vector<16x16xbf16>, vector<16x384xbf16>, vector<16x384xf32> -> vector<16x384xf32>
    %c0_4 = arith.constant 0 : index
    %c0_5 = arith.constant 0 : index
    %4 = vector.load %arg3[%c0_4, %c0_5] : memref<1x384xf32, #tpu.memory_space<vmem>>, vector<1x384xf32>
    %5 = vector.broadcast %4 : vector<1x384xf32> to vector<16x384xf32>
    %6 = arith.addf %3, %5 : vector<16x384xf32>
    %7 = vector.extract_strided_slice %6 {offsets = [0, 0], sizes = [16, 128], strides = [1, 1]} : vector<16x384xf32> to vector<16x128xf32>
    %8 = vector.extract_strided_slice %6 {offsets = [0, 128], sizes = [16, 128], strides = [1, 1]} : vector<16x384xf32> to vector<16x128xf32>
    %9 = vector.extract_strided_slice %6 {offsets = [0, 256], sizes = [16, 128], strides = [1, 1]} : vector<16x384xf32> to vector<16x128xf32>
    %10 = vector.extract_strided_slice %7 {offsets = [0, 0], sizes = [16, 32], strides = [1, 1]} : vector<16x128xf32> to vector<16x32xf32>
    %11 = vector.shape_cast %10 : vector<16x32xf32> to vector<2x8x32xf32>
    %12 = vector.extract_strided_slice %8 {offsets = [0, 0], sizes = [16, 32], strides = [1, 1]} : vector<16x128xf32> to vector<16x32xf32>
    %13 = vector.shape_cast %12 : vector<16x32xf32> to vector<2x8x32xf32>
    %14 = vector.extract_strided_slice %9 {offsets = [0, 0], sizes = [16, 32], strides = [1, 1]} : vector<16x128xf32> to vector<16x32xf32>
    %15 = vector.shape_cast %14 : vector<16x32xf32> to vector<2x8x32xf32>
    %16 = arith.truncf %11 : vector<2x8x32xf32> to vector<2x8x32xbf16>
    %17 = arith.truncf %13 : vector<2x8x32xf32> to vector<2x8x32xbf16>
    "tpu.trace_start"() <{level = 10 : i32, message = "bnd,bmd->bnm"}> : () -> ()
    %cst_6 = arith.constant dense<0.000000e+00> : vector<2x8x8xf32>
    %18 = tpu.matmul %16, %17, %cst_6 {dimension_numbers = #tpu.dot_dimension_numbers<[2], [2], [1], [1], [0, 0, 0, 1, 1, 1], [0], [0]>} : vector<2x8x32xbf16>, vector<2x8x32xbf16>, vector<2x8x8xf32> -> vector<2x8x8xf32>
    "tpu.trace_stop"() : () -> ()
    %cst_7 = arith.constant dense<0xFF800000> : vector<2x8xf32>
    %19 = vector.multi_reduction <maximumf>, %18, %cst_7 [2] : vector<2x8x8xf32> to vector<2x8xf32>
    %20 = vector.shape_cast %19 : vector<2x8xf32> to vector<2x8x1xf32>
    %21 = vector.broadcast %20 : vector<2x8x1xf32> to vector<2x8x8xf32>
    %22 = arith.subf %18, %21 : vector<2x8x8xf32>
    %23 = math.exp %22 : vector<2x8x8xf32>
    %cst_8 = arith.constant dense<0.000000e+00> : vector<2x8xf32>
    %24 = vector.multi_reduction <add>, %23, %cst_8 [2] : vector<2x8x8xf32> to vector<2x8xf32>
    %25 = vector.shape_cast %24 : vector<2x8xf32> to vector<2x8x1xf32>
    %26 = tpu.reciprocal %25 : vector<2x8x1xf32> -> vector<2x8x1xf32>
    %27 = arith.truncf %23 : vector<2x8x8xf32> to vector<2x8x8xbf16>
    %28 = arith.truncf %15 : vector<2x8x32xf32> to vector<2x8x32xbf16>
    "tpu.trace_start"() <{level = 10 : i32, message = "bnm,bmd->bnd"}> : () -> ()
    %cst_9 = arith.constant dense<0.000000e+00> : vector<2x8x32xf32>
    %29 = tpu.matmul %27, %28, %cst_9 {dimension_numbers = #tpu.dot_dimension_numbers<[2], [1], [1], [2], [0, 0, 0, 1, 1, 2], [0], [0]>} : vector<2x8x8xbf16>, vector<2x8x32xbf16>, vector<2x8x32xf32> -> vector<2x8x32xf32>
    "tpu.trace_stop"() : () -> ()
    %30 = vector.broadcast %26 : vector<2x8x1xf32> to vector<2x8x32xf32>
    %31 = arith.mulf %29, %30 : vector<2x8x32xf32>
    %32 = arith.addf %11, %31 : vector<2x8x32xf32>
    %33 = vector.shape_cast %32 : vector<2x8x32xf32> to vector<16x32xf32>
    %c0_10 = arith.constant 0 : index
    %c0_11 = arith.constant 0 : index
    %34 = vector.load %arg11[%c0_10, %c0_11] : memref<16x128xf32, #tpu.memory_space<vmem>>, vector<16x32xf32>
    tpu.vector_store %arg11[%c0_10, %c0_11], %33 {strides = array<i32>} : memref<16x128xf32, #tpu.memory_space<vmem>>, vector<16x32xf32>,
    %35 = vector.extract_strided_slice %7 {offsets = [0, 32], sizes = [16, 32], strides = [1, 1]} : vector<16x128xf32> to vector<16x32xf32>
    %36 = vector.shape_cast %35 : vector<16x32xf32> to vector<2x8x32xf32>
    %37 = vector.extract_strided_slice %8 {offsets = [0, 32], sizes = [16, 32], strides = [1, 1]} : vector<16x128xf32> to vector<16x32xf32>
    %38 = vector.shape_cast %37 : vector<16x32xf32> to vector<2x8x32xf32>
    %39 = vector.extract_strided_slice %9 {offsets = [0, 32], sizes = [16, 32], strides = [1, 1]} : vector<16x128xf32> to vector<16x32xf32>
    %40 = vector.shape_cast %39 : vector<16x32xf32> to vector<2x8x32xf32>
    %41 = arith.truncf %36 : vector<2x8x32xf32> to vector<2x8x32xbf16>
    %42 = arith.truncf %38 : vector<2x8x32xf32> to vector<2x8x32xbf16>
    "tpu.trace_start"() <{level = 10 : i32, message = "bnd,bmd->bnm"}> : () -> ()
    %cst_12 = arith.constant dense<0.000000e+00> : vector<2x8x8xf32>
    %43 = tpu.matmul %41, %42, %cst_12 {dimension_numbers = #tpu.dot_dimension_numbers<[2], [2], [1], [1], [0, 0, 0, 1, 1, 1], [0], [0]>} : vector<2x8x32xbf16>, vector<2x8x32xbf16>, vector<2x8x8xf32> -> vector<2x8x8xf32>
    "tpu.trace_stop"() : () -> ()
    %cst_13 = arith.constant dense<0xFF800000> : vector<2x8xf32>
    %44 = vector.multi_reduction <maximumf>, %43, %cst_13 [2] : vector<2x8x8xf32> to vector<2x8xf32>
    %45 = vector.shape_cast %44 : vector<2x8xf32> to vector<2x8x1xf32>
    %46 = vector.broadcast %45 : vector<2x8x1xf32> to vector<2x8x8xf32>
    %47 = arith.subf %43, %46 : vector<2x8x8xf32>
    %48 = math.exp %47 : vector<2x8x8xf32>
    %cst_14 = arith.constant dense<0.000000e+00> : vector<2x8xf32>
    %49 = vector.multi_reduction <add>, %48, %cst_14 [2] : vector<2x8x8xf32> to vector<2x8xf32>
    %50 = vector.shape_cast %49 : vector<2x8xf32> to vector<2x8x1xf32>
    %51 = tpu.reciprocal %50 : vector<2x8x1xf32> -> vector<2x8x1xf32>
    %52 = arith.truncf %48 : vector<2x8x8xf32> to vector<2x8x8xbf16>
    %53 = arith.truncf %40 : vector<2x8x32xf32> to vector<2x8x32xbf16>
    "tpu.trace_start"() <{level = 10 : i32, message = "bnm,bmd->bnd"}> : () -> ()
    %cst_15 = arith.constant dense<0.000000e+00> : vector<2x8x32xf32>
    %54 = tpu.matmul %52, %53, %cst_15 {dimension_numbers = #tpu.dot_dimension_numbers<[2], [1], [1], [2], [0, 0, 0, 1, 1, 2], [0], [0]>} : vector<2x8x8xbf16>, vector<2x8x32xbf16>, vector<2x8x32xf32> -> vector<2x8x32xf32>
    "tpu.trace_stop"() : () -> ()
    %55 = vector.broadcast %51 : vector<2x8x1xf32> to vector<2x8x32xf32>
    %56 = arith.mulf %54, %55 : vector<2x8x32xf32>
    %57 = arith.addf %36, %56 : vector<2x8x32xf32>
    %58 = vector.shape_cast %57 : vector<2x8x32xf32> to vector<16x32xf32>
    %c0_16 = arith.constant 0 : index
    %c32 = arith.constant 32 : index
    %59 = vector.load %arg11[%c0_16, %c32] : memref<16x128xf32, #tpu.memory_space<vmem>>, vector<16x32xf32>
    tpu.vector_store %arg11[%c0_16, %c32], %58 {strides = array<i32>} : memref<16x128xf32, #tpu.memory_space<vmem>>, vector<16x32xf32>,
    %60 = vector.extract_strided_slice %7 {offsets = [0, 64], sizes = [16, 32], strides = [1, 1]} : vector<16x128xf32> to vector<16x32xf32>
    %61 = vector.shape_cast %60 : vector<16x32xf32> to vector<2x8x32xf32>
    %62 = vector.extract_strided_slice %8 {offsets = [0, 64], sizes = [16, 32], strides = [1, 1]} : vector<16x128xf32> to vector<16x32xf32>
    %63 = vector.shape_cast %62 : vector<16x32xf32> to vector<2x8x32xf32>
    %64 = vector.extract_strided_slice %9 {offsets = [0, 64], sizes = [16, 32], strides = [1, 1]} : vector<16x128xf32> to vector<16x32xf32>
    %65 = vector.shape_cast %64 : vector<16x32xf32> to vector<2x8x32xf32>
    %66 = arith.truncf %61 : vector<2x8x32xf32> to vector<2x8x32xbf16>
    %67 = arith.truncf %63 : vector<2x8x32xf32> to vector<2x8x32xbf16>
    "tpu.trace_start"() <{level = 10 : i32, message = "bnd,bmd->bnm"}> : () -> ()
    %cst_17 = arith.constant dense<0.000000e+00> : vector<2x8x8xf32>
    %68 = tpu.matmul %66, %67, %cst_17 {dimension_numbers = #tpu.dot_dimension_numbers<[2], [2], [1], [1], [0, 0, 0, 1, 1, 1], [0], [0]>} : vector<2x8x32xbf16>, vector<2x8x32xbf16>, vector<2x8x8xf32> -> vector<2x8x8xf32>
    "tpu.trace_stop"() : () -> ()
    %cst_18 = arith.constant dense<0xFF800000> : vector<2x8xf32>
    %69 = vector.multi_reduction <maximumf>, %68, %cst_18 [2] : vector<2x8x8xf32> to vector<2x8xf32>
    %70 = vector.shape_cast %69 : vector<2x8xf32> to vector<2x8x1xf32>
    %71 = vector.broadcast %70 : vector<2x8x1xf32> to vector<2x8x8xf32>
    %72 = arith.subf %68, %71 : vector<2x8x8xf32>
    %73 = math.exp %72 : vector<2x8x8xf32>
    %cst_19 = arith.constant dense<0.000000e+00> : vector<2x8xf32>
    %74 = vector.multi_reduction <add>, %73, %cst_19 [2] : vector<2x8x8xf32> to vector<2x8xf32>
    %75 = vector.shape_cast %74 : vector<2x8xf32> to vector<2x8x1xf32>
    %76 = tpu.reciprocal %75 : vector<2x8x1xf32> -> vector<2x8x1xf32>
    %77 = arith.truncf %73 : vector<2x8x8xf32> to vector<2x8x8xbf16>
    %78 = arith.truncf %65 : vector<2x8x32xf32> to vector<2x8x32xbf16>
    "tpu.trace_start"() <{level = 10 : i32, message = "bnm,bmd->bnd"}> : () -> ()
    %cst_20 = arith.constant dense<0.000000e+00> : vector<2x8x32xf32>
    %79 = tpu.matmul %77, %78, %cst_20 {dimension_numbers = #tpu.dot_dimension_numbers<[2], [1], [1], [2], [0, 0, 0, 1, 1, 2], [0], [0]>} : vector<2x8x8xbf16>, vector<2x8x32xbf16>, vector<2x8x32xf32> -> vector<2x8x32xf32>
    "tpu.trace_stop"() : () -> ()
    %80 = vector.broadcast %76 : vector<2x8x1xf32> to vector<2x8x32xf32>
    %81 = arith.mulf %79, %80 : vector<2x8x32xf32>
    %82 = arith.addf %61, %81 : vector<2x8x32xf32>
    %83 = vector.shape_cast %82 : vector<2x8x32xf32> to vector<16x32xf32>
    %c0_21 = arith.constant 0 : index
    %c64 = arith.constant 64 : index
    %84 = vector.load %arg11[%c0_21, %c64] : memref<16x128xf32, #tpu.memory_space<vmem>>, vector<16x32xf32>
    tpu.vector_store %arg11[%c0_21, %c64], %83 {strides = array<i32>} : memref<16x128xf32, #tpu.memory_space<vmem>>, vector<16x32xf32>,
    %85 = vector.extract_strided_slice %7 {offsets = [0, 96], sizes = [16, 32], strides = [1, 1]} : vector<16x128xf32> to vector<16x32xf32>
    %86 = vector.shape_cast %85 : vector<16x32xf32> to vector<2x8x32xf32>
    %87 = vector.extract_strided_slice %8 {offsets = [0, 96], sizes = [16, 32], strides = [1, 1]} : vector<16x128xf32> to vector<16x32xf32>
    %88 = vector.shape_cast %87 : vector<16x32xf32> to vector<2x8x32xf32>
    %89 = vector.extract_strided_slice %9 {offsets = [0, 96], sizes = [16, 32], strides = [1, 1]} : vector<16x128xf32> to vector<16x32xf32>
    %90 = vector.shape_cast %89 : vector<16x32xf32> to vector<2x8x32xf32>
    %91 = arith.truncf %86 : vector<2x8x32xf32> to vector<2x8x32xbf16>
    %92 = arith.truncf %88 : vector<2x8x32xf32> to vector<2x8x32xbf16>
    "tpu.trace_start"() <{level = 10 : i32, message = "bnd,bmd->bnm"}> : () -> ()
    %cst_22 = arith.constant dense<0.000000e+00> : vector<2x8x8xf32>
    %93 = tpu.matmul %91, %92, %cst_22 {dimension_numbers = #tpu.dot_dimension_numbers<[2], [2], [1], [1], [0, 0, 0, 1, 1, 1], [0], [0]>} : vector<2x8x32xbf16>, vector<2x8x32xbf16>, vector<2x8x8xf32> -> vector<2x8x8xf32>
    "tpu.trace_stop"() : () -> ()
    %cst_23 = arith.constant dense<0xFF800000> : vector<2x8xf32>
    %94 = vector.multi_reduction <maximumf>, %93, %cst_23 [2] : vector<2x8x8xf32> to vector<2x8xf32>
    %95 = vector.shape_cast %94 : vector<2x8xf32> to vector<2x8x1xf32>
    %96 = vector.broadcast %95 : vector<2x8x1xf32> to vector<2x8x8xf32>
    %97 = arith.subf %93, %96 : vector<2x8x8xf32>
    %98 = math.exp %97 : vector<2x8x8xf32>
    %cst_24 = arith.constant dense<0.000000e+00> : vector<2x8xf32>
    %99 = vector.multi_reduction <add>, %98, %cst_24 [2] : vector<2x8x8xf32> to vector<2x8xf32>
    %100 = vector.shape_cast %99 : vector<2x8xf32> to vector<2x8x1xf32>
    %101 = tpu.reciprocal %100 : vector<2x8x1xf32> -> vector<2x8x1xf32>
    %102 = arith.truncf %98 : vector<2x8x8xf32> to vector<2x8x8xbf16>
    %103 = arith.truncf %90 : vector<2x8x32xf32> to vector<2x8x32xbf16>
    "tpu.trace_start"() <{level = 10 : i32, message = "bnm,bmd->bnd"}> : () -> ()
    %cst_25 = arith.constant dense<0.000000e+00> : vector<2x8x32xf32>
    %104 = tpu.matmul %102, %103, %cst_25 {dimension_numbers = #tpu.dot_dimension_numbers<[2], [1], [1], [2], [0, 0, 0, 1, 1, 2], [0], [0]>} : vector<2x8x8xbf16>, vector<2x8x32xbf16>, vector<2x8x32xf32> -> vector<2x8x32xf32>
    "tpu.trace_stop"() : () -> ()
    %105 = vector.broadcast %101 : vector<2x8x1xf32> to vector<2x8x32xf32>
    %106 = arith.mulf %104, %105 : vector<2x8x32xf32>
    %107 = arith.addf %86, %106 : vector<2x8x32xf32>
    %108 = vector.shape_cast %107 : vector<2x8x32xf32> to vector<16x32xf32>
    %c0_26 = arith.constant 0 : index
    %c96 = arith.constant 96 : index
    %109 = vector.load %arg11[%c0_26, %c96] : memref<16x128xf32, #tpu.memory_space<vmem>>, vector<16x32xf32>
    tpu.vector_store %arg11[%c0_26, %c96], %108 {strides = array<i32>} : memref<16x128xf32, #tpu.memory_space<vmem>>, vector<16x32xf32>,
    %c0_27 = arith.constant 0 : index
    %c0_28 = arith.constant 0 : index
    %110 = vector.load %arg11[%c0_27, %c0_28] : memref<16x128xf32, #tpu.memory_space<vmem>>, vector<16x128xf32>
    %111 = arith.truncf %110 : vector<16x128xf32> to vector<16x128xbf16>
    %c0_29 = arith.constant 0 : index
    %c0_30 = arith.constant 0 : index
    %112 = vector.load %arg4[%c0_29, %c0_30] : memref<128x128xbf16, #tpu.memory_space<vmem>>, vector<128x128xbf16>
    %cst_31 = arith.constant dense<0.000000e+00> : vector<16x128xf32>
    %113 = tpu.matmul %111, %112, %cst_31 {dimension_numbers = #tpu.dot_dimension_numbers<[1], [0], [0], [1], [0, 0, 1, 1], [], []>} : vector<16x128xbf16>, vector<128x128xbf16>, vector<16x128xf32> -> vector<16x128xf32>
    %c0_32 = arith.constant 0 : index
    %c0_33 = arith.constant 0 : index
    %114 = vector.load %arg5[%c0_32, %c0_33] : memref<1x128xf32, #tpu.memory_space<vmem>>, vector<1x128xf32>
    %115 = vector.broadcast %114 : vector<1x128xf32> to vector<16x128xf32>
    %116 = arith.addf %113, %115 : vector<16x128xf32>
    %cst_34 = arith.constant 0.000000e+00 : f32
    %117 = vector.broadcast %cst_34 : f32 to vector<16x128xf32>
    %118 = arith.maximumf %116, %117 : vector<16x128xf32>
    %119 = arith.addf %110, %118 : vector<16x128xf32>
    %120 = arith.truncf %119 : vector<16x128xf32> to vector<16x128xbf16>
    %c0_35 = arith.constant 0 : index
    %c0_36 = arith.constant 0 : index
    %121 = vector.load %arg6[%c0_35, %c0_36] : memref<128x384xbf16, #tpu.memory_space<vmem>>, vector<128x384xbf16>
    %cst_37 = arith.constant dense<0.000000e+00> : vector<16x384xf32>
    %122 = tpu.matmul %120, %121, %cst_37 {dimension_numbers = #tpu.dot_dimension_numbers<[1], [0], [0], [1], [0, 0, 1, 1], [], []>} : vector<16x128xbf16>, vector<128x384xbf16>, vector<16x384xf32> -> vector<16x384xf32>
    %c0_38 = arith.constant 0 : index
    %c0_39 = arith.constant 0 : index
    %123 = vector.load %arg7[%c0_38, %c0_39] : memref<1x384xf32, #tpu.memory_space<vmem>>, vector<1x384xf32>
    %124 = vector.broadcast %123 : vector<1x384xf32> to vector<16x384xf32>
    %125 = arith.addf %122, %124 : vector<16x384xf32>
    %126 = vector.extract_strided_slice %125 {offsets = [0, 0], sizes = [16, 128], strides = [1, 1]} : vector<16x384xf32> to vector<16x128xf32>
    %127 = vector.extract_strided_slice %125 {offsets = [0, 128], sizes = [16, 128], strides = [1, 1]} : vector<16x384xf32> to vector<16x128xf32>
    %128 = vector.extract_strided_slice %125 {offsets = [0, 256], sizes = [16, 128], strides = [1, 1]} : vector<16x384xf32> to vector<16x128xf32>
    %129 = vector.extract_strided_slice %126 {offsets = [0, 0], sizes = [16, 32], strides = [1, 1]} : vector<16x128xf32> to vector<16x32xf32>
    %130 = vector.shape_cast %129 : vector<16x32xf32> to vector<2x8x32xf32>
    %131 = vector.extract_strided_slice %127 {offsets = [0, 0], sizes = [16, 32], strides = [1, 1]} : vector<16x128xf32> to vector<16x32xf32>
    %132 = vector.shape_cast %131 : vector<16x32xf32> to vector<2x8x32xf32>
    %133 = vector.extract_strided_slice %128 {offsets = [0, 0], sizes = [16, 32], strides = [1, 1]} : vector<16x128xf32> to vector<16x32xf32>
    %134 = vector.shape_cast %133 : vector<16x32xf32> to vector<2x8x32xf32>
    %135 = arith.truncf %130 : vector<2x8x32xf32> to vector<2x8x32xbf16>
    %136 = arith.truncf %132 : vector<2x8x32xf32> to vector<2x8x32xbf16>
    "tpu.trace_start"() <{level = 10 : i32, message = "bnd,bmd->bnm"}> : () -> ()
    %cst_40 = arith.constant dense<0.000000e+00> : vector<2x8x8xf32>
    %137 = tpu.matmul %135, %136, %cst_40 {dimension_numbers = #tpu.dot_dimension_numbers<[2], [2], [1], [1], [0, 0, 0, 1, 1, 1], [0], [0]>} : vector<2x8x32xbf16>, vector<2x8x32xbf16>, vector<2x8x8xf32> -> vector<2x8x8xf32>
    "tpu.trace_stop"() : () -> ()
    %cst_41 = arith.constant dense<0xFF800000> : vector<2x8xf32>
    %138 = vector.multi_reduction <maximumf>, %137, %cst_41 [2] : vector<2x8x8xf32> to vector<2x8xf32>
    %139 = vector.shape_cast %138 : vector<2x8xf32> to vector<2x8x1xf32>
    %140 = vector.broadcast %139 : vector<2x8x1xf32> to vector<2x8x8xf32>
    %141 = arith.subf %137, %140 : vector<2x8x8xf32>
    %142 = math.exp %141 : vector<2x8x8xf32>
    %cst_42 = arith.constant dense<0.000000e+00> : vector<2x8xf32>
    %143 = vector.multi_reduction <add>, %142, %cst_42 [2] : vector<2x8x8xf32> to vector<2x8xf32>
    %144 = vector.shape_cast %143 : vector<2x8xf32> to vector<2x8x1xf32>
    %145 = tpu.reciprocal %144 : vector<2x8x1xf32> -> vector<2x8x1xf32>
    %146 = arith.truncf %142 : vector<2x8x8xf32> to vector<2x8x8xbf16>
    %147 = arith.truncf %134 : vector<2x8x32xf32> to vector<2x8x32xbf16>
    "tpu.trace_start"() <{level = 10 : i32, message = "bnm,bmd->bnd"}> : () -> ()
    %cst_43 = arith.constant dense<0.000000e+00> : vector<2x8x32xf32>
    %148 = tpu.matmul %146, %147, %cst_43 {dimension_numbers = #tpu.dot_dimension_numbers<[2], [1], [1], [2], [0, 0, 0, 1, 1, 2], [0], [0]>} : vector<2x8x8xbf16>, vector<2x8x32xbf16>, vector<2x8x32xf32> -> vector<2x8x32xf32>
    "tpu.trace_stop"() : () -> ()
    %149 = vector.broadcast %145 : vector<2x8x1xf32> to vector<2x8x32xf32>
    %150 = arith.mulf %148, %149 : vector<2x8x32xf32>
    %151 = arith.addf %130, %150 : vector<2x8x32xf32>
    %152 = vector.shape_cast %151 : vector<2x8x32xf32> to vector<16x32xf32>
    %c0_44 = arith.constant 0 : index
    %c0_45 = arith.constant 0 : index
    %153 = vector.load %arg11[%c0_44, %c0_45] : memref<16x128xf32, #tpu.memory_space<vmem>>, vector<16x32xf32>
    tpu.vector_store %arg11[%c0_44, %c0_45], %152 {strides = array<i32>} : memref<16x128xf32, #tpu.memory_space<vmem>>, vector<16x32xf32>,
    %154 = vector.extract_strided_slice %126 {offsets = [0, 32], sizes = [16, 32], strides = [1, 1]} : vector<16x128xf32> to vector<16x32xf32>
    %155 = vector.shape_cast %154 : vector<16x32xf32> to vector<2x8x32xf32>
    %156 = vector.extract_strided_slice %127 {offsets = [0, 32], sizes = [16, 32], strides = [1, 1]} : vector<16x128xf32> to vector<16x32xf32>
    %157 = vector.shape_cast %156 : vector<16x32xf32> to vector<2x8x32xf32>
    %158 = vector.extract_strided_slice %128 {offsets = [0, 32], sizes = [16, 32], strides = [1, 1]} : vector<16x128xf32> to vector<16x32xf32>
    %159 = vector.shape_cast %158 : vector<16x32xf32> to vector<2x8x32xf32>
    %160 = arith.truncf %155 : vector<2x8x32xf32> to vector<2x8x32xbf16>
    %161 = arith.truncf %157 : vector<2x8x32xf32> to vector<2x8x32xbf16>
    "tpu.trace_start"() <{level = 10 : i32, message = "bnd,bmd->bnm"}> : () -> ()
    %cst_46 = arith.constant dense<0.000000e+00> : vector<2x8x8xf32>
    %162 = tpu.matmul %160, %161, %cst_46 {dimension_numbers = #tpu.dot_dimension_numbers<[2], [2], [1], [1], [0, 0, 0, 1, 1, 1], [0], [0]>} : vector<2x8x32xbf16>, vector<2x8x32xbf16>, vector<2x8x8xf32> -> vector<2x8x8xf32>
    "tpu.trace_stop"() : () -> ()
    %cst_47 = arith.constant dense<0xFF800000> : vector<2x8xf32>
    %163 = vector.multi_reduction <maximumf>, %162, %cst_47 [2] : vector<2x8x8xf32> to vector<2x8xf32>
    %164 = vector.shape_cast %163 : vector<2x8xf32> to vector<2x8x1xf32>
    %165 = vector.broadcast %164 : vector<2x8x1xf32> to vector<2x8x8xf32>
    %166 = arith.subf %162, %165 : vector<2x8x8xf32>
    %167 = math.exp %166 : vector<2x8x8xf32>
    %cst_48 = arith.constant dense<0.000000e+00> : vector<2x8xf32>
    %168 = vector.multi_reduction <add>, %167, %cst_48 [2] : vector<2x8x8xf32> to vector<2x8xf32>
    %169 = vector.shape_cast %168 : vector<2x8xf32> to vector<2x8x1xf32>
    %170 = tpu.reciprocal %169 : vector<2x8x1xf32> -> vector<2x8x1xf32>
    %171 = arith.truncf %167 : vector<2x8x8xf32> to vector<2x8x8xbf16>
    %172 = arith.truncf %159 : vector<2x8x32xf32> to vector<2x8x32xbf16>
    "tpu.trace_start"() <{level = 10 : i32, message = "bnm,bmd->bnd"}> : () -> ()
    %cst_49 = arith.constant dense<0.000000e+00> : vector<2x8x32xf32>
    %173 = tpu.matmul %171, %172, %cst_49 {dimension_numbers = #tpu.dot_dimension_numbers<[2], [1], [1], [2], [0, 0, 0, 1, 1, 2], [0], [0]>} : vector<2x8x8xbf16>, vector<2x8x32xbf16>, vector<2x8x32xf32> -> vector<2x8x32xf32>
    "tpu.trace_stop"() : () -> ()
    %174 = vector.broadcast %170 : vector<2x8x1xf32> to vector<2x8x32xf32>
    %175 = arith.mulf %173, %174 : vector<2x8x32xf32>
    %176 = arith.addf %155, %175 : vector<2x8x32xf32>
    %177 = vector.shape_cast %176 : vector<2x8x32xf32> to vector<16x32xf32>
    %c0_50 = arith.constant 0 : index
    %c32_51 = arith.constant 32 : index
    %178 = vector.load %arg11[%c0_50, %c32_51] : memref<16x128xf32, #tpu.memory_space<vmem>>, vector<16x32xf32>
    tpu.vector_store %arg11[%c0_50, %c32_51], %177 {strides = array<i32>} : memref<16x128xf32, #tpu.memory_space<vmem>>, vector<16x32xf32>,
    %179 = vector.extract_strided_slice %126 {offsets = [0, 64], sizes = [16, 32], strides = [1, 1]} : vector<16x128xf32> to vector<16x32xf32>
    %180 = vector.shape_cast %179 : vector<16x32xf32> to vector<2x8x32xf32>
    %181 = vector.extract_strided_slice %127 {offsets = [0, 64], sizes = [16, 32], strides = [1, 1]} : vector<16x128xf32> to vector<16x32xf32>
    %182 = vector.shape_cast %181 : vector<16x32xf32> to vector<2x8x32xf32>
    %183 = vector.extract_strided_slice %128 {offsets = [0, 64], sizes = [16, 32], strides = [1, 1]} : vector<16x128xf32> to vector<16x32xf32>
    %184 = vector.shape_cast %183 : vector<16x32xf32> to vector<2x8x32xf32>
    %185 = arith.truncf %180 : vector<2x8x32xf32> to vector<2x8x32xbf16>
    %186 = arith.truncf %182 : vector<2x8x32xf32> to vector<2x8x32xbf16>
    "tpu.trace_start"() <{level = 10 : i32, message = "bnd,bmd->bnm"}> : () -> ()
    %cst_52 = arith.constant dense<0.000000e+00> : vector<2x8x8xf32>
    %187 = tpu.matmul %185, %186, %cst_52 {dimension_numbers = #tpu.dot_dimension_numbers<[2], [2], [1], [1], [0, 0, 0, 1, 1, 1], [0], [0]>} : vector<2x8x32xbf16>, vector<2x8x32xbf16>, vector<2x8x8xf32> -> vector<2x8x8xf32>
    "tpu.trace_stop"() : () -> ()
    %cst_53 = arith.constant dense<0xFF800000> : vector<2x8xf32>
    %188 = vector.multi_reduction <maximumf>, %187, %cst_53 [2] : vector<2x8x8xf32> to vector<2x8xf32>
    %189 = vector.shape_cast %188 : vector<2x8xf32> to vector<2x8x1xf32>
    %190 = vector.broadcast %189 : vector<2x8x1xf32> to vector<2x8x8xf32>
    %191 = arith.subf %187, %190 : vector<2x8x8xf32>
    %192 = math.exp %191 : vector<2x8x8xf32>
    %cst_54 = arith.constant dense<0.000000e+00> : vector<2x8xf32>
    %193 = vector.multi_reduction <add>, %192, %cst_54 [2] : vector<2x8x8xf32> to vector<2x8xf32>
    %194 = vector.shape_cast %193 : vector<2x8xf32> to vector<2x8x1xf32>
    %195 = tpu.reciprocal %194 : vector<2x8x1xf32> -> vector<2x8x1xf32>
    %196 = arith.truncf %192 : vector<2x8x8xf32> to vector<2x8x8xbf16>
    %197 = arith.truncf %184 : vector<2x8x32xf32> to vector<2x8x32xbf16>
    "tpu.trace_start"() <{level = 10 : i32, message = "bnm,bmd->bnd"}> : () -> ()
    %cst_55 = arith.constant dense<0.000000e+00> : vector<2x8x32xf32>
    %198 = tpu.matmul %196, %197, %cst_55 {dimension_numbers = #tpu.dot_dimension_numbers<[2], [1], [1], [2], [0, 0, 0, 1, 1, 2], [0], [0]>} : vector<2x8x8xbf16>, vector<2x8x32xbf16>, vector<2x8x32xf32> -> vector<2x8x32xf32>
    "tpu.trace_stop"() : () -> ()
    %199 = vector.broadcast %195 : vector<2x8x1xf32> to vector<2x8x32xf32>
    %200 = arith.mulf %198, %199 : vector<2x8x32xf32>
    %201 = arith.addf %180, %200 : vector<2x8x32xf32>
    %202 = vector.shape_cast %201 : vector<2x8x32xf32> to vector<16x32xf32>
    %c0_56 = arith.constant 0 : index
    %c64_57 = arith.constant 64 : index
    %203 = vector.load %arg11[%c0_56, %c64_57] : memref<16x128xf32, #tpu.memory_space<vmem>>, vector<16x32xf32>
    tpu.vector_store %arg11[%c0_56, %c64_57], %202 {strides = array<i32>} : memref<16x128xf32, #tpu.memory_space<vmem>>, vector<16x32xf32>,
    %204 = vector.extract_strided_slice %126 {offsets = [0, 96], sizes = [16, 32], strides = [1, 1]} : vector<16x128xf32> to vector<16x32xf32>
    %205 = vector.shape_cast %204 : vector<16x32xf32> to vector<2x8x32xf32>
    %206 = vector.extract_strided_slice %127 {offsets = [0, 96], sizes = [16, 32], strides = [1, 1]} : vector<16x128xf32> to vector<16x32xf32>
    %207 = vector.shape_cast %206 : vector<16x32xf32> to vector<2x8x32xf32>
    %208 = vector.extract_strided_slice %128 {offsets = [0, 96], sizes = [16, 32], strides = [1, 1]} : vector<16x128xf32> to vector<16x32xf32>
    %209 = vector.shape_cast %208 : vector<16x32xf32> to vector<2x8x32xf32>
    %210 = arith.truncf %205 : vector<2x8x32xf32> to vector<2x8x32xbf16>
    %211 = arith.truncf %207 : vector<2x8x32xf32> to vector<2x8x32xbf16>
    "tpu.trace_start"() <{level = 10 : i32, message = "bnd,bmd->bnm"}> : () -> ()
    %cst_58 = arith.constant dense<0.000000e+00> : vector<2x8x8xf32>
    %212 = tpu.matmul %210, %211, %cst_58 {dimension_numbers = #tpu.dot_dimension_numbers<[2], [2], [1], [1], [0, 0, 0, 1, 1, 1], [0], [0]>} : vector<2x8x32xbf16>, vector<2x8x32xbf16>, vector<2x8x8xf32> -> vector<2x8x8xf32>
    "tpu.trace_stop"() : () -> ()
    %cst_59 = arith.constant dense<0xFF800000> : vector<2x8xf32>
    %213 = vector.multi_reduction <maximumf>, %212, %cst_59 [2] : vector<2x8x8xf32> to vector<2x8xf32>
    %214 = vector.shape_cast %213 : vector<2x8xf32> to vector<2x8x1xf32>
    %215 = vector.broadcast %214 : vector<2x8x1xf32> to vector<2x8x8xf32>
    %216 = arith.subf %212, %215 : vector<2x8x8xf32>
    %217 = math.exp %216 : vector<2x8x8xf32>
    %cst_60 = arith.constant dense<0.000000e+00> : vector<2x8xf32>
    %218 = vector.multi_reduction <add>, %217, %cst_60 [2] : vector<2x8x8xf32> to vector<2x8xf32>
    %219 = vector.shape_cast %218 : vector<2x8xf32> to vector<2x8x1xf32>
    %220 = tpu.reciprocal %219 : vector<2x8x1xf32> -> vector<2x8x1xf32>
    %221 = arith.truncf %217 : vector<2x8x8xf32> to vector<2x8x8xbf16>
    %222 = arith.truncf %209 : vector<2x8x32xf32> to vector<2x8x32xbf16>
    "tpu.trace_start"() <{level = 10 : i32, message = "bnm,bmd->bnd"}> : () -> ()
    %cst_61 = arith.constant dense<0.000000e+00> : vector<2x8x32xf32>
    %223 = tpu.matmul %221, %222, %cst_61 {dimension_numbers = #tpu.dot_dimension_numbers<[2], [1], [1], [2], [0, 0, 0, 1, 1, 2], [0], [0]>} : vector<2x8x8xbf16>, vector<2x8x32xbf16>, vector<2x8x32xf32> -> vector<2x8x32xf32>
    "tpu.trace_stop"() : () -> ()
    %224 = vector.broadcast %220 : vector<2x8x1xf32> to vector<2x8x32xf32>
    %225 = arith.mulf %223, %224 : vector<2x8x32xf32>
    %226 = arith.addf %205, %225 : vector<2x8x32xf32>
    %227 = vector.shape_cast %226 : vector<2x8x32xf32> to vector<16x32xf32>
    %c0_62 = arith.constant 0 : index
    %c96_63 = arith.constant 96 : index
    %228 = vector.load %arg11[%c0_62, %c96_63] : memref<16x128xf32, #tpu.memory_space<vmem>>, vector<16x32xf32>
    tpu.vector_store %arg11[%c0_62, %c96_63], %227 {strides = array<i32>} : memref<16x128xf32, #tpu.memory_space<vmem>>, vector<16x32xf32>,
    %c0_64 = arith.constant 0 : index
    %c0_65 = arith.constant 0 : index
    %229 = vector.load %arg11[%c0_64, %c0_65] : memref<16x128xf32, #tpu.memory_space<vmem>>, vector<16x128xf32>
    %230 = arith.truncf %229 : vector<16x128xf32> to vector<16x128xbf16>
    %c0_66 = arith.constant 0 : index
    %c0_67 = arith.constant 0 : index
    %231 = vector.load %arg8[%c0_66, %c0_67] : memref<128x128xbf16, #tpu.memory_space<vmem>>, vector<128x128xbf16>
    %cst_68 = arith.constant dense<0.000000e+00> : vector<16x128xf32>
    %232 = tpu.matmul %230, %231, %cst_68 {dimension_numbers = #tpu.dot_dimension_numbers<[1], [0], [0], [1], [0, 0, 1, 1], [], []>} : vector<16x128xbf16>, vector<128x128xbf16>, vector<16x128xf32> -> vector<16x128xf32>
    %c0_69 = arith.constant 0 : index
    %c0_70 = arith.constant 0 : index
    %233 = vector.load %arg9[%c0_69, %c0_70] : memref<1x128xf32, #tpu.memory_space<vmem>>, vector<1x128xf32>
    %234 = vector.broadcast %233 : vector<1x128xf32> to vector<16x128xf32>
    %235 = arith.addf %232, %234 : vector<16x128xf32>
    %cst_71 = arith.constant 0.000000e+00 : f32
    %236 = vector.broadcast %cst_71 : f32 to vector<16x128xf32>
    %237 = arith.maximumf %235, %236 : vector<16x128xf32>
    %238 = arith.addf %229, %237 : vector<16x128xf32>
    %239 = vector.shape_cast %238 : vector<16x128xf32> to vector<2x8x128xf32>
    %c0_72 = arith.constant 0 : index
    %c0_73 = arith.constant 0 : index
    %c0_74 = arith.constant 0 : index
    %240 = vector.load %arg10[%c0_72, %c0_73, %c0_74] : memref<2x8x128xf32, #tpu.memory_space<vmem>>, vector<2x8x128xf32>
    tpu.vector_store %arg10[%c0_72, %c0_73, %c0_74], %239 {strides = array<i32>} : memref<2x8x128xf32, #tpu.memory_space<vmem>>, vector<2x8x128xf32>,
    return
  }
  func.func @transform_0(%arg0: i32) -> (i32, i32, i32) {
    %c0_i32 = arith.constant 0 : i32
    %c0_i32_0 = arith.constant 0 : i32
    %c0_i32_1 = arith.constant 0 : i32
    return %arg0, %c0_i32, %c0_i32_0 : i32, i32, i32
  }
  func.func @transform_1(%arg0: i32) -> (i32, i32) {
    %c0_i32 = arith.constant 0 : i32
    %c0_i32_0 = arith.constant 0 : i32
    %c0_i32_1 = arith.constant 0 : i32
    return %c0_i32, %c0_i32_0 : i32, i32
  }
  func.func @transform_2(%arg0: i32) -> (i32, i32) {
    %c0_i32 = arith.constant 0 : i32
    %c0_i32_0 = arith.constant 0 : i32
    %c0_i32_1 = arith.constant 0 : i32
    return %c0_i32, %c0_i32_0 : i32, i32
  }
  func.func @transform_3(%arg0: i32) -> (i32, i32) {
    %c0_i32 = arith.constant 0 : i32
    %c0_i32_0 = arith.constant 0 : i32
    %c0_i32_1 = arith.constant 0 : i32
    return %c0_i32, %c0_i32_0 : i32, i32
  }
  func.func @transform_4(%arg0: i32) -> (i32, i32) {
    %c0_i32 = arith.constant 0 : i32
    %c0_i32_0 = arith.constant 0 : i32
    %c0_i32_1 = arith.constant 0 : i32
    return %c0_i32, %c0_i32_0 : i32, i32
  }
  func.func @transform_5(%arg0: i32) -> (i32, i32) {
    %c0_i32 = arith.constant 0 : i32
    %c0_i32_0 = arith.constant 0 : i32
    %c0_i32_1 = arith.constant 0 : i32
    return %c0_i32, %c0_i32_0 : i32, i32
  }
  func.func @transform_6(%arg0: i32) -> (i32, i32) {
    %c0_i32 = arith.constant 0 : i32
    %c0_i32_0 = arith.constant 0 : i32
    %c0_i32_1 = arith.constant 0 : i32
    return %c0_i32, %c0_i32_0 : i32, i32
  }
  func.func @transform_7(%arg0: i32) -> (i32, i32) {
    %c0_i32 = arith.constant 0 : i32
    %c0_i32_0 = arith.constant 0 : i32
    %c0_i32_1 = arith.constant 0 : i32
    return %c0_i32, %c0_i32_0 : i32, i32
  }
  func.func @transform_8(%arg0: i32) -> (i32, i32) {
    %c0_i32 = arith.constant 0 : i32
    %c0_i32_0 = arith.constant 0 : i32
    %c0_i32_1 = arith.constant 0 : i32
    return %c0_i32, %c0_i32_0 : i32, i32
  }
  func.func @transform_9(%arg0: i32) -> (i32, i32, i32) {
    %c0_i32 = arith.constant 0 : i32
    %c0_i32_0 = arith.constant 0 : i32
    %c0_i32_1 = arith.constant 0 : i32
    return %arg0, %c0_i32, %c0_i32_0 : i32, i32, i32
  }
}

</mosaic_0001>

<bundles_post_ra>
// kernel: trajectory_encoder.1
= control target key start
LH: loop header
LB: loop body
LE: loop exit
PB: predicated region body
PF: predicated region fallthrough
CT: control target
= control target key end

     0   :  { %v3111_v2 = vmov 0   ;;  %vm78_vm0 = vcmask 130048   ;;  %v3112_v5 = vmov 0.0   ;;  %s3811_s0 = inlined_call_operand.vmem [shape: bf16[2,8,16], index: 0, kind: input, shape index: {}]   ;;  %s3812_s1 = inlined_call_operand.vmem [shape: bf16[16,384], index: 1, kind: input, shape index: {}]   ;;  %s3813_s2 = inlined_call_operand.vmem [shape: f32[1,384], index: 2, kind: input, shape index: {}]   ;;  %s3814_s3 = inlined_call_operand.vmem [shape: bf16[128,128], index: 3, kind: input, shape index: {}]   ;;  %s3815_s4 = inlined_call_operand.vmem [shape: f32[1,128], index: 4, kind: input, shape index: {}]   ;;  %s3816_s5 = inlined_call_operand.vmem [shape: bf16[128,384], index: 5, kind: input, shape index: {}]   ;;  %s3817_s6 = inlined_call_operand.vmem [shape: f32[1,384], index: 6, kind: input, shape index: {}]   ;;  %s3818_s7 = inlined_call_operand.vmem [shape: bf16[128,128], index: 7, kind: input, shape index: {}]   ;;  %s3819_s8 = inlined_call_operand.vmem [shape: f32[1,128], index: 8, kind: input, shape index: {}]   ;;  %s3820_s9 = inlined_call_operand.hbm [shape: f32[2,8,128], index: 9, kind: output, shape index: {}]  }
   0x1   :  { %v2970_v0 = vld [vmem:[%s3812_s1 + $0x4] ss:$12 sps:$4 sm:$0xff]   ;;  %v2972_v1 = vld [vmem:[%s3812_s1] ss:$12 sps:$4 sm:$0xff]   ;;  %114 = vmatprep.mubr.bf16.mxu1 %v3111_v2  ;;  %v2974_v4 = vld [vmem:[%s3812_s1 + $0x8] ss:$12 sps:$4 sm:$0xff]   ;;  %2721 = vmatprep.subr.bf16.mxu0 %v3112_v5 }
   0x2   :  { %82 = vmatprep.subr.bf16.mxu1 %v2970_v0  ;;  %v2973_v3 = vld [vmem:[%s3811_s0] sm:$0xff]  }
   0x3   :  { %83 = vmatpush1.bf16.msra.mxu1 %v2972_v1 }
   0x4   :  { %2703 = vmatprep.subr.bf16.mxu1 %v3112_v5 }
   0x6   :  { %2534 = vmatmul.mubr.msk.bf16.vlgmr.msra.gmra.mrb[0].mxu1 %vm78_vm0, %v2973_v3 }
   0x7   :  { %2704 = vmatpush3.bf16.msra.mxu1 %v2974_v4 }
   0x8   :  { %2709 = vmatprep.subr.bf16.mxu1 %v3112_v5 }
   0x9   :  { %14 = vsyncpa [#allocation4], 0  ;;  %vm3113_vm1 = vmmov 0   ;;  %v42_v6 = vlaneseq  ;;  %v40_v9 = vld [vmem:[%s3813_s2] sm:$0x7]  ;;  %vm170_vm2 = vcmask 261120  }
   0xa   :  { %2705 = vmatprep.mubr.msk.bf16.mxu1 %vm3113_vm1, %v3112_v5  ;;  %2723 = vmatprep.mubr.msk.bf16.mxu0 %vm3113_vm1, %v3112_v5  ;;  %s3114_s17 = smov 96   ;;  %vm291_vm3 = vcmask 1043456   ;;  %vm263_vm4 = vcmask 64512   ;;  %s3115_s2 = smov 64   ;;  %vm623_vm5 = vcmask 523520   ;;  %vm856_vm6 = vcmask 785920  }
   0xb   :  { %v3192_v7 = vshrl.u32 %v42_v6, 7  ;;  %s3116_s18 = smov 32   ;;  %vm1089_vm7 = vcmask 1048320  }
   0xd   :  { %v48_v8 = vsub.s32 1, %v3192_v7  ;;  %v44_v11 = vsub.s32 0, %v3192_v7  ;;  %v52_v27 = vsub.s32 2, %v3192_v7 }
   0xe   :  { %2706 = vmatmul.mubr.msk.bf16.vlgmr.msra.gmra.mrb[4].mxu1 %vm78_vm0, %v2973_v3 }
   0xf   :  { %2711 = vmatprep.mubr.msk.bf16.mxu1 %vm3113_vm1, %v3112_v5  ;;  %v49_v10 = vrot.slane %v40_v9, %v48_v8  ;;  %v45_v17 = vrot.slane %v40_v9, %v44_v11  ;;  %v53_v28 = vrot.slane %v40_v9, %v52_v27 }
  0xd9   :  { %v116_v12 = vpop.f32.mrb[0].mxu1 }
  0xda   :  { %v118_v13 = vpop.f32.mrb[1].mxu1  ;;  %v3209_v21 = vadd.f32 %v116_v12, %v45_v17 }
  0xdb   :  { %v119_v14 = vadd.f32 %v118_v13, %v49_v10  ;;  %v120_v15 = vpop.f32.mrb[2].mxu1 }
  0xdc   :  { %v122_v16 = vpop.f32.mrb[3].mxu1  ;;  %v3211_v22 = vadd.f32 %v120_v15, %v45_v17  ;;  %v3224_v25 = vpack.c.bf16 %v3209_v21, %v3209_v21 }
  0xdd   :  { %v3203_v18 = vpack.c.bf16 %v119_v14, %v119_v14  ;;  %v123_v19 = vadd.f32 %v122_v16, %v49_v10 }
  0xde   :  { %v3220_v24 = vpack.c.bf16 %v3211_v22, %v3211_v22 }
  0xdf   :  { %391 = vrot.lane.b32.xlu1 %v3203_v18, %s3114_s17  ;;  %v175_v20 = vsel %vm170_vm2, %v3203_v18, 0  ;;  %v3213_v23 = vpack.c.bf16 %v123_v19, %v123_v19 }
  0xe0   :  { %2710 = vmatpush3.bf16.xpose.msra.mxu1 %v175_v20 }
  0xe1   :  { %2715 = vmatprep.subr.bf16.mxu1 %v3112_v5  ;;  %v221_v26 = vsel %vm170_vm2, %v3213_v23, 0  ;;  %v159_v29 = vpop.f32.mrb[4].mxu1 }
  0xe2   :  { %v160_v30 = vadd.f32 %v159_v29, %v53_v28  ;;  %v2707_v31 = vpop.f32.mrb[5].mxu1 }
  0xe3   :  { %443 = vrot.lane.b32.xlu1 %v3213_v23, %s3114_s17  ;;  %v162_v32 = vpop.f32.mrb[6].mxu1 }
  0xe4   :  { %v3242_v33 = vpack.c.bf16 %v160_v30, %v160_v30  ;;  %v163_v34 = vadd.f32 %v162_v32, %v53_v28  ;;  %v2708_v35 = vpop.f32.mrb[7].mxu1 }
  0xe6   :  { %v3244_v36 = vpack.c.bf16 %v163_v34, %v163_v34  ;;  %v293_v37 = vsel %vm291_vm3, %v3242_v33, 0 }
  0xe7   :  { %440 = vrot.lane.b32.xlu1 %v3220_v24, %s3114_s17  ;;  %2712 = vmatmul.mubr.msk.bf16.vlgmr.msra.gmra.mrb[8].mxu1 %vm170_vm2, %v3224_v25 }
  0xe8   :  { %2716 = vmatpush3.bf16.xpose.msra.mxu1 %v221_v26  ;;  %2717 = vmatprep.mubr.msk.bf16.mxu1 %vm3113_vm1, %v3112_v5  ;;  %v339_v38 = vsel %vm291_vm3, %v3244_v36, 0 }
  0xe9   :  { %2727 = vmatprep.subr.bf16.mxu1 %v3112_v5  ;;  %2722 = vmatpush3.bf16.msra.mxu0 %v293_v37 }
  0xea   :  { %2733 = vmatprep.subr.bf16.mxu0 %v3112_v5 }
  0xeb   :  { %514 = vrot.lane.b32.xlu1 %v3242_v33, %s3114_s17 }
  0xef   :  { %2718 = vmatmul.mubr.msk.bf16.vlgmr.msra.gmra.mrb[12].mxu1 %vm170_vm2, %v3220_v24 }
  0xf0   :  { %2729 = vmatprep.mubr.msk.bf16.mxu1 %vm3113_vm1, %v3112_v5  ;;  %2728 = vmatpush3.bf16.msra.mxu1 %v339_v38 }
  0xf1   :  { %2739 = vmatprep.subr.bf16.mxu1 %v3112_v5 }
 0x151   :  { %v392_v52 = vpop.permute.xlu1 %391 }
 0x152   :  { %v397_v59 = vsel %vm170_vm2, %v392_v52, 0 }
 0x155   :  { %v444_v56 = vpop.permute.xlu1 %443 }
 0x156   :  { %v449_v1 = vsel %vm170_vm2, %v444_v56, 0 }
 0x159   :  { %v441_v60 = vpop.permute.xlu1 %440 }
 0x15d   :  { %v515_v62 = vpop.permute.xlu1 %514 }
 0x15e   :  { %v520_v3 = vsel %vm291_vm3, %v515_v62, 0 }
 0x1ba   :  { %v211_v39 = vpop.f32.mrb[8].mxu1 }
 0x1bb   :  { %v2713_v40 = vpop.f32.mrb[9].mxu1  ;;  %v264_v41 = vsel %vm263_vm4, %v211_v39, -inf }
 0x1bc   :  { %265 = vmax.xlane.f32.xlu0 %v264_v41  ;;  %v214_v42 = vpop.f32.mrb[10].mxu1 }
 0x1bd   :  { %v2714_v43 = vpop.f32.mrb[11].mxu1 }
 0x1c2   :  { %v257_v44 = vpop.f32.mrb[12].mxu1 }
 0x1c3   :  { %v2719_v45 = vpop.f32.mrb[13].mxu1  ;;  %v267_v46 = vsel %vm263_vm4, %v257_v44, -inf }
 0x1c4   :  { %268 = vmax.xlane.f32.xlu0 %v267_v46  ;;  %v260_v47 = vpop.f32.mrb[14].mxu1 }
 0x1c5   :  { %v2720_v48 = vpop.f32.mrb[15].mxu1 }
 0x1da   :  { %388 = vrot.lane.b32.xlu0 %v3224_v25, %s3114_s17 }
 0x249   :  { %v266_v49 = vpop.xlane.xlu0 %265 }
 0x24a   :  { %v270_v50 = vsub.f32 %v211_v39, %v266_v49 }
 0x24c   :  { %v272_v51 = vmul.f32 1.442695, %v270_v50 }
 0x24e   :  { %3023 = vpow2.f32 %v272_v51 }
 0x251   :  { %v269_v53 = vpop.xlane.xlu0 %268 }
 0x252   :  { %v271_v54 = vsub.f32 %v257_v44, %v269_v53 }
 0x254   :  { %v274_v55 = vmul.f32 1.442695, %v271_v54 }
 0x255   :  { %v389_v0 = vpop.permute.xlu0 %388 }
 0x256   :  { %3025 = vpow2.f32 %v274_v55 }
 0x258   :  { %v3258_v57 = vpop.eup %3023 }
 0x259   :  { %v284_v58 = vpack.c.bf16 %v3258_v57, %v3258_v57 }
 0x25b   :  { %2724 = vmatmul.mubr.msk.bf16.vlgmr.msra.gmra.mrb[0].mxu0 %vm263_vm4, %v284_v58 }
 0x25c   :  { %2734 = vmatpush3.bf16.xpose.msra.mxu0 %v397_v59  ;;  %2735 = vmatprep.mubr.msk.bf16.mxu0 %vm3113_vm1, %v3112_v5 }
 0x25d   :  { %2745 = vmatprep.subr.bf16.mxu0 %v3112_v5 }
 0x260   :  { %v3267_v61 = vpop.eup %3025 }
 0x261   :  { %v285_v63 = vpack.c.bf16 %v3267_v61, %v3267_v61 }
 0x263   :  { %2730 = vmatmul.mubr.msk.bf16.vlgmr.msra.gmra.mrb[16].mxu1 %vm263_vm4, %v285_v63  ;;  %2736 = vmatmul.mubr.msk.bf16.vlgmr.msra.gmra.mrb[4].mxu0 %vm170_vm2, %v389_v0 }
 0x264   :  { %2740 = vmatpush3.bf16.xpose.msra.mxu1 %v449_v1  ;;  %2746 = vmatpush3.bf16.msra.mxu0 %v520_v3 }
 0x265   :  { %2741 = vmatprep.mubr.msk.bf16.mxu1 %vm3113_vm1, %v3112_v5  ;;  %2751 = vmatprep.subr.bf16.mxu1 %v3112_v5 }
 0x266   :  { %2747 = vmatprep.mubr.msk.bf16.mxu0 %vm3113_vm1, %v3112_v5  ;;  %2757 = vmatprep.subr.bf16.mxu0 %v3112_v5 }
 0x26b   :  { %2742 = vmatmul.mubr.msk.bf16.vlgmr.msra.gmra.mrb[20].mxu1 %vm170_vm2, %v441_v60 }
 0x26c   :  { %2753 = vmatprep.mubr.msk.bf16.mxu1 %vm3113_vm1, %v3112_v5 }
 0x32e   :  { %v3284_v4 = vpop.f32.mrb[0].mxu0 }
 0x32f   :  { %v2725_v6 = vpop.f32.mrb[1].mxu0 }
 0x330   :  { %v332_v9 = vpop.f32.mrb[2].mxu0 }
 0x331   :  { %v2726_v10 = vpop.f32.mrb[3].mxu0 }
 0x336   :  { %v3286_v12 = vpop.f32.mrb[16].mxu1  ;;  %v433_v13 = vpop.f32.mrb[4].mxu0 }
 0x337   :  { %v2731_v14 = vpop.f32.mrb[17].mxu1  ;;  %v2737_v15 = vpop.f32.mrb[5].mxu0  ;;  %v491_v16 = vsel %vm263_vm4, %v433_v13, -inf }
 0x338   :  { %492 = vmax.xlane.f32.xlu1 %v491_v16  ;;  %v378_v17 = vpop.f32.mrb[18].mxu1  ;;  %v436_v19 = vpop.f32.mrb[6].mxu0 }
 0x339   :  { %v2732_v20 = vpop.f32.mrb[19].mxu1  ;;  %v2738_v26 = vpop.f32.mrb[7].mxu0 }
 0x33e   :  { %v485_v28 = vpop.f32.mrb[20].mxu1 }
 0x33f   :  { %v2743_v29 = vpop.f32.mrb[21].mxu1  ;;  %v494_v30 = vsel %vm263_vm4, %v485_v28, -inf }
 0x340   :  { %495 = vmax.xlane.f32.xlu0 %v494_v30  ;;  %v488_v31 = vpop.f32.mrb[22].mxu1 }
 0x341   :  { %v2744_v32 = vpop.f32.mrb[23].mxu1 }
 0x349   :  { %628 = vrot.lane.b32.xlu1 %v3203_v18, %s3115_s2 }
 0x34d   :  { %678 = vrot.lane.b32.xlu1 %v3213_v23, %s3115_s2 }
 0x351   :  { %626 = vrot.lane.b32.xlu1 %v3224_v25, %s3115_s2 }
 0x355   :  { %676 = vrot.lane.b32.xlu1 %v3220_v24, %s3115_s2 }
 0x356   :  { %563 = vrot.lane.b32.xlu0 %v3244_v36, %s3114_s17 }
 0x359   :  { %796 = vrot.lane.b32.xlu1 %v3244_v36, %s3115_s2 }
 0x35a   :  { %748 = vrot.lane.b32.xlu0 %v3242_v33, %s3115_s2 }
 0x3c5   :  { %v493_v34 = vpop.xlane.xlu1 %492 }
 0x3c6   :  { %v497_v35 = vsub.f32 %v433_v13, %v493_v34 }
 0x3c8   :  { %v499_v37 = vmul.f32 1.442695, %v497_v35 }
 0x3c9   :  { %v629_v38 = vpop.permute.xlu1 %628 }
 0x3ca   :  { %3027 = vpow2.f32 %v499_v37  ;;  %v634_v47 = vsel %vm170_vm2, %v629_v38, 0 }
 0x3cd   :  { %v496_v39 = vpop.xlane.xlu0 %495  ;;  %v679_v43 = vpop.permute.xlu1 %678 }
 0x3ce   :  { %v498_v40 = vsub.f32 %v485_v28, %v496_v39  ;;  %v684_v53 = vsel %vm170_vm2, %v679_v43, 0 }
 0x3d0   :  { %v501_v41 = vmul.f32 1.442695, %v498_v40 }
 0x3d1   :  { %v564_v42 = vpop.permute.xlu0 %563  ;;  %v627_v48 = vpop.permute.xlu1 %626 }
 0x3d2   :  { %3029 = vpow2.f32 %v501_v41  ;;  %v569_v44 = vsel %vm291_vm3, %v564_v42, 0 }
 0x3d3   :  { %2752 = vmatpush3.bf16.msra.mxu1 %v569_v44 }
 0x3d4   :  { %v3305_v45 = vpop.eup %3027  ;;  %2763 = vmatprep.subr.bf16.mxu1 %v3112_v5 }
 0x3d5   :  { %v511_v46 = vpack.c.bf16 %v3305_v45, %v3305_v45  ;;  %v749_v50 = vpop.permute.xlu0 %748  ;;  %v677_v52 = vpop.permute.xlu1 %676 }
 0x3d6   :  { %v754_v54 = vsel %vm291_vm3, %v749_v50, 0 }
 0x3d7   :  { %2748 = vmatmul.mubr.msk.bf16.vlgmr.msra.gmra.mrb[8].mxu0 %vm263_vm4, %v511_v46 }
 0x3d8   :  { %2758 = vmatpush3.bf16.xpose.msra.mxu0 %v634_v47  ;;  %2759 = vmatprep.mubr.msk.bf16.mxu0 %vm3113_vm1, %v3112_v5 }
 0x3d9   :  { %2769 = vmatprep.subr.bf16.mxu0 %v3112_v5  ;;  %v797_v55 = vpop.permute.xlu1 %796 }
 0x3da   :  { %v802_v56 = vsel %vm291_vm3, %v797_v55, 0 }
 0x3dc   :  { %v3315_v49 = vpop.eup %3029 }
 0x3dd   :  { %v512_v51 = vpack.c.bf16 %v3315_v49, %v3315_v49 }
 0x3df   :  { %2754 = vmatmul.mubr.msk.bf16.vlgmr.msra.gmra.mrb[24].mxu1 %vm263_vm4, %v512_v51  ;;  %2760 = vmatmul.mubr.msk.bf16.vlgmr.msra.gmra.mrb[12].mxu0 %vm170_vm2, %v627_v48 }
 0x3e0   :  { %2764 = vmatpush3.bf16.xpose.msra.mxu1 %v684_v53  ;;  %2770 = vmatpush3.bf16.msra.mxu0 %v754_v54 }
 0x3e1   :  { %2765 = vmatprep.mubr.msk.bf16.mxu1 %vm3113_vm1, %v3112_v5  ;;  %2775 = vmatprep.subr.bf16.mxu1 %v3112_v5 }
 0x3e2   :  { %2771 = vmatprep.mubr.msk.bf16.mxu0 %vm3113_vm1, %v3112_v5  ;;  %2781 = vmatprep.subr.bf16.mxu0 %v3112_v5 }
 0x3e7   :  { %2766 = vmatmul.mubr.msk.bf16.vlgmr.msra.gmra.mrb[28].mxu1 %vm170_vm2, %v677_v52 }
 0x3e8   :  { %2776 = vmatpush3.bf16.msra.mxu1 %v802_v56  ;;  %2777 = vmatprep.mubr.msk.bf16.mxu1 %vm3113_vm1, %v3112_v5 }
 0x3e9   :  { %2787 = vmatprep.subr.bf16.mxu1 %v3112_v5 }
 0x4aa   :  { %v3334_v58 = vpop.f32.mrb[8].mxu0 }
 0x4ab   :  { %v2749_v59 = vpop.f32.mrb[9].mxu0 }
 0x4ac   :  { %v559_v60 = vpop.f32.mrb[10].mxu0 }
 0x4ad   :  { %v2750_v62 = vpop.f32.mrb[11].mxu0 }
 0x4b2   :  { %v3336_v63 = vpop.f32.mrb[24].mxu1  ;;  %v670_v0 = vpop.f32.mrb[12].mxu0 }
 0x4b3   :  { %v2755_v1 = vpop.f32.mrb[25].mxu1  ;;  %v2761_v3 = vpop.f32.mrb[13].mxu0  ;;  %v726_v6 = vsel %vm263_vm4, %v670_v0, -inf }
 0x4b4   :  { %727 = vmax.xlane.f32.xlu1 %v726_v6  ;;  %v608_v9 = vpop.f32.mrb[26].mxu1  ;;  %v673_v10 = vpop.f32.mrb[14].mxu0  ;;  %v503_v1 = vsel %vm263_vm4, %v3305_v45, 0.0  ;;  %v506_v6 = vsel %vm263_vm4, %v3315_v49, 0.0 }
 0x4b5   :  { %v2756_v13 = vpop.f32.mrb[27].mxu1  ;;  %v2762_v14 = vpop.f32.mrb[15].mxu0 }
 0x4ba   :  { %v720_v15 = vpop.f32.mrb[28].mxu1 }
 0x4bb   :  { %v2767_v16 = vpop.f32.mrb[29].mxu1  ;;  %v729_v17 = vsel %vm263_vm4, %v720_v15, -inf }
 0x4bc   :  { %730 = vmax.xlane.f32.xlu0 %v729_v17  ;;  %v723_v19 = vpop.f32.mrb[30].mxu1 }
 0x4bd   :  { %v2768_v20 = vpop.f32.mrb[31].mxu1 }
 0x4c5   :  { %861 = vrot.lane.b32.xlu1 %v3203_v18, %s3116_s18 }
 0x4c9   :  { %859 = vrot.lane.b32.xlu1 %v3224_v25, %s3116_s18 }
 0x4d2   :  { %911 = vrot.lane.b32.xlu0 %v3213_v23, %s3116_s18 }
 0x4d6   :  { %909 = vrot.lane.b32.xlu0 %v3220_v24, %s3116_s18 }
 0x541   :  { %v728_v26 = vpop.xlane.xlu1 %727 }
 0x542   :  { %v732_v28 = vsub.f32 %v670_v0, %v728_v26 }
 0x544   :  { %v734_v29 = vmul.f32 1.442695, %v732_v28  ;;  %v276_v28 = vsel %vm263_vm4, %v3258_v57, 0.0 }
 0x545   :  { %v862_v35 = vpop.permute.xlu1 %861 }
 0x546   :  { %3031 = vpow2.f32 %v734_v29  ;;  %v867_v37 = vsel %vm170_vm2, %v862_v35, 0 }
 0x549   :  { %v731_v30 = vpop.xlane.xlu0 %730  ;;  %v860_v38 = vpop.permute.xlu1 %859 }
 0x54a   :  { %v733_v31 = vsub.f32 %v720_v15, %v731_v30 }
 0x54c   :  { %v736_v32 = vmul.f32 1.442695, %v733_v31 }
 0x54d   :  { %v912_v24 = vpop.permute.xlu0 %911 }
 0x54e   :  { %3033 = vpow2.f32 %v736_v32  ;;  %v917_v39 = vsel %vm170_vm2, %v912_v24, 0  ;;  %v279_v32 = vsel %vm263_vm4, %v3267_v61, 0.0 }
 0x550   :  { %v3032_v34 = vpop.eup %3031 }
 0x551   :  { %v746_v18 = vpack.c.bf16 %v3032_v34, %v3032_v34  ;;  %v910_v40 = vpop.permute.xlu0 %909  ;;  %v738_v9 = vsel %vm263_vm4, %v3032_v34, 0.0 }
 0x553   :  { %2772 = vmatmul.mubr.msk.bf16.vlgmr.msra.gmra.mrb[16].mxu0 %vm263_vm4, %v746_v18 }
 0x554   :  { %2782 = vmatpush3.bf16.xpose.msra.mxu0 %v867_v37  ;;  %2783 = vmatprep.mubr.msk.bf16.mxu0 %vm3113_vm1, %v3112_v5 }
 0x555   :  { %2793 = vmatprep.subr.bf16.mxu0 %v3112_v5 }
 0x558   :  { %v3034_v23 = vpop.eup %3033 }
 0x559   :  { %v747_v25 = vpack.c.bf16 %v3034_v23, %v3034_v23  ;;  %v741_v3 = vsel %vm263_vm4, %v3034_v23, 0.0 }
 0x55b   :  { %2778 = vmatmul.mubr.msk.bf16.vlgmr.msra.gmra.mrb[32].mxu1 %vm263_vm4, %v747_v25  ;;  %2784 = vmatmul.mubr.msk.bf16.vlgmr.msra.gmra.mrb[20].mxu0 %vm170_vm2, %v860_v38 }
 0x55c   :  { %2788 = vmatpush3.bf16.xpose.msra.mxu1 %v917_v39  ;;  %2789 = vmatprep.mubr.msk.bf16.mxu1 %vm3113_vm1, %v3112_v5 }
 0x55d   :  { %2799 = vmatprep.subr.bf16.mxu1 %v3112_v5  ;;  %2795 = vmatprep.mubr.msk.bf16.mxu0 %vm3113_vm1, %v3112_v5 }
 0x563   :  { %2790 = vmatmul.mubr.msk.bf16.vlgmr.msra.gmra.mrb[36].mxu1 %vm170_vm2, %v910_v40  ;;  %v2976_v40 = vld [vmem:[%s3814_s3 + $0x8] sm:$0xff]  }
 0x564   :  { %2801 = vmatprep.mubr.msk.bf16.mxu1 %vm3113_vm1, %v3112_v5 }
 0x626   :  { %v3364_v41 = vpop.f32.mrb[16].mxu0 }
 0x627   :  { %v2773_v42 = vpop.f32.mrb[17].mxu0 }
 0x628   :  { %v793_v43 = vpop.f32.mrb[18].mxu0 }
 0x629   :  { %v2774_v44 = vpop.f32.mrb[19].mxu0 }
 0x62e   :  { %v3366_v46 = vpop.f32.mrb[32].mxu1  ;;  %v903_v47 = vpop.f32.mrb[20].mxu0 }
 0x62f   :  { %v2779_v48 = vpop.f32.mrb[33].mxu1  ;;  %v2785_v50 = vpop.f32.mrb[21].mxu0  ;;  %v959_v51 = vsel %vm263_vm4, %v903_v47, -inf }
 0x630   :  { %960 = vmax.xlane.f32.xlu1 %v959_v51  ;;  %v841_v52 = vpop.f32.mrb[34].mxu1  ;;  %v906_v53 = vpop.f32.mrb[22].mxu0 }
 0x631   :  { %v2780_v54 = vpop.f32.mrb[35].mxu1  ;;  %v2786_v55 = vpop.f32.mrb[23].mxu0 }
 0x636   :  { %v953_v56 = vpop.f32.mrb[36].mxu1 }
 0x637   :  { %v2791_v59 = vpop.f32.mrb[37].mxu1  ;;  %v962_v60 = vsel %vm263_vm4, %v953_v56, -inf }
 0x638   :  { %963 = vmax.xlane.f32.xlu0 %v962_v60  ;;  %v956_v62 = vpop.f32.mrb[38].mxu1 }
 0x639   :  { %v2792_v0 = vpop.f32.mrb[39].mxu1  ;;  %v2978_v62 = vld [vmem:[%s3814_s3 + $0x18] sm:$0xff]  }
 0x63a   :  { %v2979_v0 = vld [vmem:[%s3814_s3 + $0x20] sm:$0xff]  }
 0x641   :  { %1029 = vrot.lane.b32.xlu1 %v3244_v36, %s3116_s18 }
 0x64e   :  { %981 = vrot.lane.b32.xlu0 %v3242_v33, %s3116_s18 }
 0x665   :  { %504 = vadd.xlane.f32.xlu1 %v503_v1  ;;  %v2980_v1 = vld [vmem:[%s3814_s3 + $0x28] sm:$0xff]  }
 0x669   :  { %742 = vadd.xlane.f32.xlu1 %v741_v3 }
 0x66d   :  { %507 = vadd.xlane.f32.xlu0 %v506_v6 }
 0x671   :  { %739 = vadd.xlane.f32.xlu0 %v738_v9  ;;  %v2981_v9 = vld [vmem:[%s3814_s3 + $0x30] sm:$0xff]  }
 0x6bd   :  { %v961_v10 = vpop.xlane.xlu1 %960 }
 0x6be   :  { %v965_v13 = vsub.f32 %v903_v47, %v961_v10 }
 0x6c0   :  { %v967_v36 = vmul.f32 1.442695, %v965_v13 }
 0x6c1   :  { %v1030_v14 = vpop.permute.xlu1 %1029 }
 0x6c2   :  { %3035 = vpow2.f32 %v967_v36  ;;  %v1035_v33 = vsel %vm291_vm3, %v1030_v14, 0 }
 0x6c3   :  { %2800 = vmatpush3.bf16.msra.mxu1 %v1035_v33  ;;  %v2982_v33 = vld [vmem:[%s3814_s3 + $0x38] sm:$0xff]  }
 0x6c5   :  { %v964_v45 = vpop.xlane.xlu0 %963 }
 0x6c6   :  { %v966_v15 = vsub.f32 %v953_v56, %v964_v45 }
 0x6c8   :  { %v969_v16 = vmul.f32 1.442695, %v966_v15 }
 0x6c9   :  { %v982_v17 = vpop.permute.xlu0 %981 }
 0x6ca   :  { %3037 = vpow2.f32 %v969_v16  ;;  %v987_v19 = vsel %vm291_vm3, %v982_v17, 0 }
 0x6cb   :  { %2794 = vmatpush3.bf16.msra.mxu0 %v987_v19 }
 0x6cc   :  { %v3036_v49 = vpop.eup %3035  ;;  %2805 = vmatprep.subr.bf16.mxu0 %v3112_v5 }
 0x6cd   :  { %v971_v20 = vsel %vm263_vm4, %v3036_v49, 0.0  ;;  %v979_v26 = vpack.c.bf16 %v3036_v49, %v3036_v49  ;;  %v2983_v49 = vld [vmem:[%s3816_s5] ss:$12 sps:$4 sm:$0xff]  }
 0x6ce   :  { %972 = vadd.xlane.f32.xlu0 %v971_v20  ;;  %v2985_v20 = vld [vmem:[%s3816_s5 + $0x4] ss:$12 sps:$4 sm:$0xff]  }
 0x6cf   :  { %2796 = vmatmul.mubr.msk.bf16.vlgmr.msra.gmra.mrb[24].mxu0 %vm263_vm4, %v979_v26  ;;  %1389 = vmatprep.subr.bf16.mxu1 %v2985_v20 }
 0x6d0   :  { %2821 = vmatprep.mubr.msk.bf16.mxu0 %vm3113_vm1, %v3112_v5 }
 0x6d2   :  { %277 = vadd.xlane.f32.xlu0 %v276_v28  ;;  %v2989_v28 = vld [vmem:[%s3816_s5 + $0x1c] ss:$12 sps:$4 sm:$0xff]  }
 0x6d4   :  { %v3038_v29 = vpop.eup %3037 }
 0x6d5   :  { %v974_v30 = vsel %vm263_vm4, %v3038_v29, 0.0  ;;  %v980_v31 = vpack.c.bf16 %v3038_v29, %v3038_v29  ;;  %v2987_v29 = vld [vmem:[%s3816_s5 + $0x18] ss:$12 sps:$4 sm:$0xff]  }
 0x6d6   :  { %975 = vadd.xlane.f32.xlu1 %v974_v30  ;;  %v2993_v30 = vld [vmem:[%s3816_s5 + $0x34] ss:$12 sps:$4 sm:$0xff]  }
 0x6d7   :  { %2802 = vmatmul.mubr.msk.bf16.vlgmr.msra.gmra.mrb[40].mxu1 %vm263_vm4, %v980_v31  ;;  %v2991_v31 = vld [vmem:[%s3816_s5 + $0x30] ss:$12 sps:$4 sm:$0xff]  }
 0x6d8   :  { %1421 = vmatprep.mubr.bf16.mxu1 %v3111_v2  ;;  %1390 = vmatpush1.bf16.msra.mxu1 %v2983_v49 }
 0x6d9   :  { %1391 = vmatprep.subr.bf16.mxu1 %v2989_v28 }
 0x6da   :  { %280 = vadd.xlane.f32.xlu1 %v279_v32  ;;  %v2997_v32 = vld [vmem:[%s3816_s5 + $0x4c] ss:$12 sps:$4 sm:$0xff]  }
 0x6dc   :  { %1392 = vmatpush1.bf16.msra.mxu1 %v2987_v29 }
 0x6dd   :  { %1393 = vmatprep.subr.bf16.mxu1 %v2993_v30 }
 0x6e0   :  { %1394 = vmatpush1.bf16.msra.mxu1 %v2991_v31 }
 0x6e1   :  { %1395 = vmatprep.subr.bf16.mxu1 %v2997_v32 }
 0x6f2   :  { %v505_v34 = vpop.xlane.xlu1 %504 }
 0x6f3   :  { %3039 = vrcp.f32 %v505_v34  ;;  %v2995_v34 = vld [vmem:[%s3816_s5 + $0x48] ss:$12 sps:$4 sm:$0xff]  }
 0x6f4   :  { %1396 = vmatpush1.bf16.msra.mxu1 %v2995_v34 }
 0x6f6   :  { %v743_v35 = vpop.xlane.xlu1 %742 }
 0x6f7   :  { %3041 = vrcp.f32 %v743_v35  ;;  %v3001_v35 = vld [vmem:[%s3816_s5 + $0x64] ss:$12 sps:$4 sm:$0xff]  }
 0x6f8   :  { %1397 = vmatprep.subr.bf16.mxu1 %v3001_v35 }
 0x6fa   :  { %v508_v18 = vpop.xlane.xlu0 %507 }
 0x6fb   :  { %3043 = vrcp.f32 %v508_v18  ;;  %v2999_v18 = vld [vmem:[%s3816_s5 + $0x60] ss:$12 sps:$4 sm:$0xff]  }
 0x6fc   :  { %1398 = vmatpush1.bf16.msra.mxu1 %v2999_v18 }
 0x6fd   :  { %v3040_v57 = vpop.eup %3039 }
 0x6fe   :  { %v740_v37 = vpop.xlane.xlu0 %739  ;;  %v611_v23 = vmul.f32 %v3040_v57, %v3334_v58  ;;  %v2975_v58 = vld [vmem:[%s3814_s3] sm:$0xff]   ;;  %v3005_v57 = vld [vmem:[%s3816_s5 + $0x7c] ss:$12 sps:$4 sm:$0xff]  }
 0x6ff   :  { %3045 = vrcp.f32 %v740_v37  ;;  %2806 = vmatpush3.bf16.msra.mxu0 %v2975_v58  ;;  %v3003_v37 = vld [vmem:[%s3816_s5 + $0x78] ss:$12 sps:$4 sm:$0xff]   ;;  %1399 = vmatprep.subr.bf16.mxu1 %v3005_v57 }
 0x700   :  { %615 = vrot.lane.b32.xlu0 %v611_v23, %s3116_s18  ;;  %2807 = vmatprep.subr.bf16.mxu0 %v3112_v5 }
 0x701   :  { %v3042_v24 = vpop.eup %3041  ;;  %1400 = vmatpush1.bf16.msra.mxu1 %v3003_v37 }
 0x702   :  { %v845_v2 = vmul.f32 %v3042_v24, %v3366_v46 }
 0x703   :  { %2808 = vmatpush3.bf16.msra.mxu0 %v2976_v40  ;;  %v2998_v40 = vld [vmem:[%s3816_s5 + $0x50] ss:$12 sps:$4 sm:$0xff]  }
 0x704   :  { %850 = vrot.lane.b32.xlu0 %v845_v2, %s3115_s2  ;;  %2809 = vmatprep.subr.bf16.mxu0 %v3112_v5 }
 0x705   :  { %v3044_v61 = vpop.eup %3043 }
 0x706   :  { %v612_v25 = vmul.f32 %v3044_v61, %v3336_v63  ;;  %v2977_v63 = vld [vmem:[%s3814_s3 + $0x10] sm:$0xff]  }
 0x707   :  { %2810 = vmatpush3.bf16.msra.mxu0 %v2977_v63  ;;  %v3002_v63 = vld [vmem:[%s3816_s5 + $0x68] ss:$12 sps:$4 sm:$0xff]  }
 0x708   :  { %617 = vrot.lane.b32.xlu1 %v612_v25, %s3116_s18  ;;  %2811 = vmatprep.subr.bf16.mxu0 %v3112_v5 }
 0x709   :  { %v3046_v38 = vpop.eup %3045 }
 0x70a   :  { %v844_v39 = vmul.f32 %v3046_v38, %v3364_v41 }
 0x70b   :  { %2812 = vmatpush3.bf16.msra.mxu0 %v2978_v62 }
 0x70c   :  { %848 = vrot.lane.b32.xlu1 %v844_v39, %s3115_s2  ;;  %2813 = vmatprep.subr.bf16.mxu0 %v3112_v5  ;;  %v2986_v39 = vld [vmem:[%s3816_s5 + $0x8] ss:$12 sps:$4 sm:$0xff]  }
 0x70f   :  { %2814 = vmatpush3.bf16.msra.mxu0 %v2979_v0  ;;  %v1244_v0 = vld [vmem:[%s3817_s6] sm:$0x7] }
 0x710   :  { %2815 = vmatprep.subr.bf16.mxu0 %v3112_v5 }
 0x713   :  { %2816 = vmatpush3.bf16.msra.mxu0 %v2980_v1  ;;  %v1253_v1 = vrot.slane %v1244_v0, %v48_v8 }
 0x714   :  { %2817 = vmatprep.subr.bf16.mxu0 %v3112_v5 }
 0x717   :  { %2818 = vmatpush3.bf16.msra.mxu0 %v2981_v9  ;;  %v1257_v9 = vrot.slane %v1244_v0, %v52_v27 }
 0x718   :  { %2819 = vmatprep.subr.bf16.mxu0 %v3112_v5 }
 0x71b   :  { %2820 = vmatpush3.bf16.msra.mxu0 %v2982_v33 }
 0x71c   :  { %2825 = vmatprep.subr.bf16.mxu0 %v3112_v5 }
 0x75b   :  { %v973_v41 = vpop.xlane.xlu0 %972 }
 0x75f   :  { %v278_v42 = vpop.xlane.xlu0 %277 }
 0x760   :  { %3047 = vrcp.f32 %v278_v42  ;;  %v3009_v42 = vld [vmem:[%s3816_s5 + $0x94] ss:$12 sps:$4 sm:$0xff]  }
 0x761   :  { %1401 = vmatprep.subr.bf16.mxu1 %v3009_v42 }
 0x763   :  { %v976_v43 = vpop.xlane.xlu1 %975 }
 0x767   :  { %v281_v44 = vpop.xlane.xlu1 %280 }
 0x768   :  { %3049 = vrcp.f32 %v281_v44  ;;  %v3010_v44 = vld [vmem:[%s3816_s5 + $0x98] ss:$12 sps:$4 sm:$0xff]  }
 0x769   :  { %3051 = vrcp.f32 %v973_v41  ;;  %v3006_v41 = vld [vmem:[%s3816_s5 + $0x80] ss:$12 sps:$4 sm:$0xff]  }
 0x76a   :  { %v3048_v46 = vpop.eup %3047  ;;  %3053 = vrcp.f32 %v976_v43  ;;  %v3007_v43 = vld [vmem:[%s3816_s5 + $0x90] ss:$12 sps:$4 sm:$0xff]  }
 0x76b   :  { %v381_v47 = vmul.f32 %v3048_v46, %v3284_v4  ;;  %1402 = vmatpush1.bf16.msra.mxu1 %v3007_v43  ;;  %v3013_v46 = vld [vmem:[%s3816_s5 + $0xac] ss:$12 sps:$4 sm:$0xff]  }
 0x76c   :  { %1403 = vmatprep.subr.bf16.mxu1 %v3013_v46 }
 0x76d   :  { %v383_v48 = vadd.f32 %v381_v47, %v3209_v21  ;;  %v3011_v47 = vld [vmem:[%s3816_s5 + $0xa8] ss:$12 sps:$4 sm:$0xff]  }
 0x76f   :  { %385 = vst.msk [vmem:[#allocation2] sm:$0xff] %vm170_vm2, %v383_v48  ;;  %v3014_v48 = vld [vmem:[%s3816_s5 + $0xb0] ss:$12 sps:$4 sm:$0xff]   ;;  %1404 = vmatpush1.bf16.msra.mxu1 %v3011_v47 }
 0x770   :  { %2845 = vmatprep.subr.bf16.mxu1 %v3112_v5 }
 0x772   :  { %v3050_v50 = vpop.eup %3049  ;;  %v616_v51 = vpop.permute.xlu0 %615 }
 0x773   :  { %v621_v52 = vadd.f32 %v616_v51, %v3209_v21  ;;  %v382_v53 = vmul.f32 %v3050_v50, %v3286_v12  ;;  %v3052_v3 = vpop.eup %3051  ;;  %v2552_v50 = vld [vmem:[%s3815_s4] ss:$0 sm:$0xff] }
 0x774   :  { %v3054_v45 = vpop.eup %3053 }
 0x775   :  { %624 = vst.msk [vmem:[#allocation2] sm:$0xff] %vm623_vm5, %v621_v52  ;;  %v384_v54 = vadd.f32 %v382_v53, %v3211_v22 }
 0x776   :  { %v851_v55 = vpop.permute.xlu0 %850 }
 0x777   :  { %386 = vst.msk [vmem:[#allocation2 + $0x8] sm:$0xff] %vm170_vm2, %v384_v54  ;;  %v855_v59 = vadd.f32 %v851_v55, %v3211_v22 }
 0x77a   :  { %v618_v56 = vpop.permute.xlu1 %617 }
 0x77b   :  { %v622_v4 = vadd.f32 %v618_v56, %v3211_v22 }
 0x77d   :  { %625 = vst.msk [vmem:[#allocation2 + $0x8] sm:$0xff] %vm623_vm5, %v622_v4 }
 0x77e   :  { %v849_v60 = vpop.permute.xlu1 %848  ;;  %858 = vst.msk [vmem:[#allocation2 + $0x8] sm:$0xff] %vm856_vm6, %v855_v59 }
 0x77f   :  { %v854_v12 = vadd.f32 %v849_v60, %v3209_v21 }
 0x781   :  { %857 = vst.msk [vmem:[#allocation2] sm:$0xff] %vm856_vm6, %v854_v12 }
 0x7a2   :  { %v1023_v6 = vpop.f32.mrb[24].mxu0 }
 0x7a3   :  { %v1077_v10 = vmul.f32 %v3052_v3, %v1023_v6  ;;  %v2797_v13 = vpop.f32.mrb[25].mxu0 }
 0x7a4   :  { %v1026_v36 = vpop.f32.mrb[26].mxu0 }
 0x7a5   :  { %v2798_v14 = vpop.f32.mrb[27].mxu0  ;;  %1081 = vrot.lane.b32.xlu1 %v1077_v10, %s3114_s17 }
 0x7aa   :  { %v1071_v15 = vpop.f32.mrb[40].mxu1 }
 0x7ab   :  { %v1078_v16 = vmul.f32 %v3054_v45, %v1071_v15  ;;  %v2803_v17 = vpop.f32.mrb[41].mxu1 }
 0x7ac   :  { %v1074_v19 = vpop.f32.mrb[42].mxu1  ;;  %v1249_v17 = vrot.slane %v1244_v0, %v44_v11 }
 0x7ad   :  { %1083 = vrot.lane.b32.xlu0 %v1078_v16, %s3114_s17  ;;  %v2804_v26 = vpop.f32.mrb[43].mxu1 }
 0x817   :  { %v1082_v23 = vpop.permute.xlu1 %1081 }
 0x818   :  { %v1087_v24 = vadd.f32 %v1082_v23, %v3209_v21  ;;  %v2990_v21 = vld [vmem:[%s3816_s5 + $0x20] ss:$12 sps:$4 sm:$0xff]  }
 0x81a   :  { %1090 = vst.msk [vmem:[#allocation2] sm:$0xff] %vm1089_vm7, %v1087_v24 }
 0x81f   :  { %v1084_v2 = vpop.permute.xlu0 %1083 }
 0x820   :  { %v1088_v61 = vadd.f32 %v1084_v2, %v3211_v22  ;;  %v2994_v22 = vld [vmem:[%s3816_s5 + $0x38] ss:$12 sps:$4 sm:$0xff]  }
 0x821   :  { %v1092_v25 = vld [vmem:[#allocation2] sm:$0xff] }
 0x822   :  { %1091 = vst.msk [vmem:[#allocation2 + $0x8] sm:$0xff] %vm1089_vm7, %v1088_v61 }
 0x829   :  { %v1093_v38 = vld [vmem:[#allocation2 + $0x8] sm:$0xff] }
 0x82a   :  { %v1094_v58 = vpack.c.bf16 %v1093_v38, %v1092_v25 }
 0x82c   :  { %2822 = vmatmul.mubr.bf16.vlgmr.msra.gmra.mrb[28].mxu0 %v1094_v58 }
 0x82d   :  { %2826 = vmatpush3.bf16.msra.mxu0 %v2986_v39  ;;  %2841 = vmatprep.mubr.msk.bf16.mxu0 %vm3113_vm1, %v3112_v5 }
 0x82e   :  { %2827 = vmatprep.subr.bf16.mxu0 %v3112_v5 }
 0x831   :  { %2828 = vmatpush3.bf16.msra.mxu0 %v2990_v21 }
 0x832   :  { %2829 = vmatprep.subr.bf16.mxu0 %v3112_v5 }
 0x835   :  { %2830 = vmatpush3.bf16.msra.mxu0 %v2994_v22 }
 0x836   :  { %2831 = vmatprep.subr.bf16.mxu0 %v3112_v5 }
 0x839   :  { %2832 = vmatpush3.bf16.msra.mxu0 %v2998_v40 }
 0x83a   :  { %2833 = vmatprep.subr.bf16.mxu0 %v3112_v5 }
 0x83d   :  { %2834 = vmatpush3.bf16.msra.mxu0 %v3002_v63 }
 0x83e   :  { %2835 = vmatprep.subr.bf16.mxu0 %v3112_v5 }
 0x841   :  { %2836 = vmatpush3.bf16.msra.mxu0 %v3006_v41 }
 0x842   :  { %2837 = vmatprep.subr.bf16.mxu0 %v3112_v5 }
 0x845   :  { %2838 = vmatpush3.bf16.msra.mxu0 %v3010_v44 }
 0x846   :  { %2839 = vmatprep.subr.bf16.mxu0 %v3112_v5 }
 0x849   :  { %2840 = vmatpush3.bf16.msra.mxu0 %v3014_v48 }
 0x84a   :  { %2869 = vmatprep.subr.bf16.mxu0 %v3112_v5 }
 0x8ff   :  { %v1200_v51 = vpop.f32.mrb[28].mxu0 }
 0x900   :  { %v1201_v52 = vadd.f32 %v2552_v50, %v1200_v51  ;;  %v2823_v53 = vpop.f32.mrb[29].mxu0 }
 0x901   :  { %v1203_v54 = vpop.f32.mrb[30].mxu0 }
 0x902   :  { %v1207_v55 = vmax.f32 %v1201_v52, 0.0  ;;  %v1204_v56 = vadd.f32 %v2552_v50, %v1203_v54  ;;  %v2824_v4 = vpop.f32.mrb[31].mxu0 }
 0x904   :  { %v1208_v59 = vmax.f32 %v1204_v56, 0.0  ;;  %v1209_v60 = vadd.f32 %v1207_v55, %v1092_v25 }
 0x906   :  { %v1210_v12 = vadd.f32 %v1208_v59, %v1093_v38 }
 0x908   :  { %v1211_v62 = vpack.c.bf16 %v1210_v12, %v1209_v60 }
 0x90a   :  { %1422 = vmatmul.mubr.bf16.vlgmr.msra.gmra.mrb[44].mxu1 %v1211_v62  ;;  %2842 = vmatmul.mubr.bf16.vlgmr.msra.gmra.mrb[32].mxu0 %v1211_v62 }
 0x90b   :  { %2847 = vmatprep.mubr.msk.bf16.mxu1 %vm3113_vm1, %v3112_v5  ;;  %2871 = vmatprep.mubr.msk.bf16.mxu0 %vm3113_vm1, %v3112_v5 }
 0x9dd   :  { %v1423_v3 = vpop.f32.mrb[44].mxu1  ;;  %v1466_v6 = vpop.f32.mrb[32].mxu0 }
 0x9de   :  { %v1425_v10 = vpop.f32.mrb[45].mxu1  ;;  %v2843_v13 = vpop.f32.mrb[33].mxu0  ;;  %v3557_v20 = vadd.f32 %v1423_v3, %v1249_v17  ;;  %v1467_v28 = vadd.f32 %v1466_v6, %v1257_v9 }
 0x9df   :  { %v1426_v36 = vadd.f32 %v1425_v10, %v1253_v1  ;;  %v1427_v14 = vpop.f32.mrb[46].mxu1  ;;  %v1469_v33 = vpop.f32.mrb[34].mxu0 }
 0x9e0   :  { %v1470_v45 = vadd.f32 %v1469_v33, %v1257_v9  ;;  %v1429_v15 = vpop.f32.mrb[47].mxu1  ;;  %v2844_v16 = vpop.f32.mrb[35].mxu0  ;;  %v3564_v26 = vpack.c.bf16 %v3557_v20, %v3557_v20  ;;  %v3572_v11 = vadd.f32 %v1427_v14, %v1249_v17  ;;  %v3575_v29 = vpack.c.bf16 %v1467_v28, %v1467_v28 }
 0x9e1   :  { %v3553_v19 = vpack.c.bf16 %v1426_v36, %v1426_v36  ;;  %v1430_v49 = vadd.f32 %v1429_v15, %v1253_v1 }
 0x9e2   :  { %v3579_v30 = vpack.c.bf16 %v3572_v11, %v3572_v11  ;;  %v1597_v31 = vsel %vm291_vm3, %v3575_v29, 0  ;;  %v3594_v25 = vpack.c.bf16 %v1470_v45, %v1470_v45 }
 0x9e3   :  { %v1481_v8 = vsel %vm170_vm2, %v3553_v19, 0  ;;  %v3560_v27 = vpack.c.bf16 %v1430_v49, %v1430_v49 }
 0x9e4   :  { %2846 = vmatpush3.bf16.xpose.msra.mxu1 %v1481_v8  ;;  %v1643_v47 = vsel %vm291_vm3, %v3594_v25, 0 }
 0x9e5   :  { %2851 = vmatprep.subr.bf16.mxu1 %v3112_v5  ;;  %v1527_v7 = vsel %vm170_vm2, %v3560_v27, 0 }
 0x9eb   :  { %2848 = vmatmul.mubr.msk.bf16.vlgmr.msra.gmra.mrb[48].mxu1 %vm170_vm2, %v3564_v26 }
 0x9ec   :  { %2852 = vmatpush3.bf16.xpose.msra.mxu1 %v1527_v7  ;;  %2853 = vmatprep.mubr.msk.bf16.mxu1 %vm3113_vm1, %v3112_v5 }
 0x9ed   :  { %2857 = vmatprep.subr.bf16.mxu1 %v3112_v5 }
 0x9f3   :  { %2854 = vmatmul.mubr.msk.bf16.vlgmr.msra.gmra.mrb[52].mxu1 %vm170_vm2, %v3579_v30 }
 0x9f4   :  { %2858 = vmatpush3.bf16.msra.mxu1 %v1597_v31  ;;  %2859 = vmatprep.mubr.msk.bf16.mxu1 %vm3113_vm1, %v3112_v5 }
 0x9f5   :  { %2863 = vmatprep.subr.bf16.mxu1 %v3112_v5 }
 0xabe   :  { %v1517_v32 = vpop.f32.mrb[48].mxu1 }
 0xabf   :  { %v2849_v34 = vpop.f32.mrb[49].mxu1  ;;  %v1569_v35 = vsel %vm263_vm4, %v1517_v32, -inf }
 0xac0   :  { %1570 = vmax.xlane.f32.xlu1 %v1569_v35  ;;  %v1520_v18 = vpop.f32.mrb[50].mxu1 }
 0xac1   :  { %v2850_v57 = vpop.f32.mrb[51].mxu1 }
 0xac6   :  { %v1563_v37 = vpop.f32.mrb[52].mxu1 }
 0xac7   :  { %v2855_v23 = vpop.f32.mrb[53].mxu1  ;;  %v1572_v24 = vsel %vm263_vm4, %v1563_v37, -inf }
 0xac8   :  { %1573 = vmax.xlane.f32.xlu0 %v1572_v24  ;;  %v1566_v2 = vpop.f32.mrb[54].mxu1 }
 0xac9   :  { %v2856_v61 = vpop.f32.mrb[55].mxu1 }
 0xad1   :  { %1747 = vrot.lane.b32.xlu1 %v3560_v27, %s3114_s17 }
 0xad5   :  { %1692 = vrot.lane.b32.xlu1 %v3564_v26, %s3114_s17 }
 0xad9   :  { %1867 = vrot.lane.b32.xlu1 %v3594_v25, %s3114_s17 }
 0xade   :  { %1695 = vrot.lane.b32.xlu0 %v3553_v19, %s3114_s17 }
 0xae2   :  { %1744 = vrot.lane.b32.xlu0 %v3579_v30, %s3114_s17 }
 0xae6   :  { %1818 = vrot.lane.b32.xlu0 %v3575_v29, %s3114_s17 }
 0xb4d   :  { %v1571_v38 = vpop.xlane.xlu1 %1570 }
 0xb4e   :  { %v1575_v39 = vsub.f32 %v1517_v32, %v1571_v38 }
 0xb50   :  { %v1577_v58 = vmul.f32 1.442695, %v1575_v39 }
 0xb51   :  { %v1748_v42 = vpop.permute.xlu1 %1747 }
 0xb52   :  { %3055 = vpow2.f32 %v1577_v58  ;;  %v1753_v54 = vsel %vm170_vm2, %v1748_v42, 0 }
 0xb55   :  { %v1574_v21 = vpop.xlane.xlu0 %1573  ;;  %v1693_v48 = vpop.permute.xlu1 %1692 }
 0xb56   :  { %v1576_v22 = vsub.f32 %v1563_v37, %v1574_v21 }
 0xb58   :  { %v1579_v40 = vmul.f32 1.442695, %v1576_v22 }
 0xb59   :  { %v1696_v63 = vpop.permute.xlu0 %1695  ;;  %v1868_v55 = vpop.permute.xlu1 %1867 }
 0xb5a   :  { %3057 = vpow2.f32 %v1579_v40  ;;  %v1701_v41 = vsel %vm170_vm2, %v1696_v63, 0  ;;  %v1873_v56 = vsel %vm291_vm3, %v1868_v55, 0 }
 0xb5b   :  { %2870 = vmatpush3.bf16.xpose.msra.mxu0 %v1701_v41 }
 0xb5c   :  { %v3605_v43 = vpop.eup %3055  ;;  %2881 = vmatprep.subr.bf16.mxu0 %v3112_v5 }
 0xb5d   :  { %v1745_v44 = vpop.permute.xlu0 %1744  ;;  %v1589_v46 = vpack.c.bf16 %v3605_v43, %v3605_v43 }
 0xb5f   :  { %2860 = vmatmul.mubr.msk.bf16.vlgmr.msra.gmra.mrb[56].mxu1 %vm263_vm4, %v1589_v46 }
 0xb60   :  { %2864 = vmatpush3.bf16.msra.mxu1 %v1643_v47  ;;  %2865 = vmatprep.mubr.msk.bf16.mxu1 %vm3113_vm1, %v3112_v5 }
 0xb61   :  { %v1819_v50 = vpop.permute.xlu0 %1818  ;;  %2875 = vmatprep.subr.bf16.mxu1 %v3112_v5 }
 0xb62   :  { %v1824_v51 = vsel %vm291_vm3, %v1819_v50, 0  ;;  %2872 = vmatmul.mubr.msk.bf16.vlgmr.msra.gmra.mrb[36].mxu0 %vm170_vm2, %v1693_v48 }
 0xb63   :  { %2882 = vmatpush3.bf16.msra.mxu0 %v1824_v51  ;;  %2883 = vmatprep.mubr.msk.bf16.mxu0 %vm3113_vm1, %v3112_v5 }
 0xb64   :  { %v3620_v52 = vpop.eup %3057  ;;  %2893 = vmatprep.subr.bf16.mxu0 %v3112_v5 }
 0xb65   :  { %v1590_v53 = vpack.c.bf16 %v3620_v52, %v3620_v52 }
 0xb67   :  { %2866 = vmatmul.mubr.msk.bf16.vlgmr.msra.gmra.mrb[60].mxu1 %vm263_vm4, %v1590_v53 }
 0xb68   :  { %2877 = vmatprep.mubr.msk.bf16.mxu1 %vm3113_vm1, %v3112_v5 }
 0xb69   :  { %2876 = vmatpush3.bf16.xpose.msra.mxu1 %v1753_v54 }
 0xb6a   :  { %2887 = vmatprep.subr.bf16.mxu1 %v3112_v5 }
 0xb70   :  { %2878 = vmatmul.mubr.msk.bf16.vlgmr.msra.gmra.mrb[64].mxu1 %vm170_vm2, %v1745_v44 }
 0xb71   :  { %2888 = vmatpush3.bf16.msra.mxu1 %v1873_v56  ;;  %2889 = vmatprep.mubr.msk.bf16.mxu1 %vm3113_vm1, %v3112_v5 }
 0xb72   :  { %2899 = vmatprep.subr.bf16.mxu1 %v3112_v5 }
 0xc32   :  { %v3635_v4 = vpop.f32.mrb[56].mxu1 }
 0xc33   :  { %v2861_v59 = vpop.f32.mrb[57].mxu1 }
 0xc34   :  { %v1636_v60 = vpop.f32.mrb[58].mxu1 }
 0xc35   :  { %v2862_v12 = vpop.f32.mrb[59].mxu1  ;;  %v1737_v62 = vpop.f32.mrb[36].mxu0 }
 0xc36   :  { %v2873_v0 = vpop.f32.mrb[37].mxu0  ;;  %v1795_v1 = vsel %vm263_vm4, %v1737_v62, -inf }
 0xc37   :  { %1796 = vmax.xlane.f32.xlu1 %v1795_v1  ;;  %v1740_v3 = vpop.f32.mrb[38].mxu0 }
 0xc38   :  { %v2874_v6 = vpop.f32.mrb[39].mxu0 }
 0xc3a   :  { %v3638_v9 = vpop.f32.mrb[60].mxu1 }
 0xc3b   :  { %v2867_v10 = vpop.f32.mrb[61].mxu1 }
 0xc3c   :  { %v1682_v13 = vpop.f32.mrb[62].mxu1 }
 0xc3d   :  { %v2868_v36 = vpop.f32.mrb[63].mxu1 }
 0xc43   :  { %v1789_v14 = vpop.f32.mrb[64].mxu1 }
 0xc44   :  { %v2879_v33 = vpop.f32.mrb[65].mxu1  ;;  %v1798_v45 = vsel %vm263_vm4, %v1789_v14, -inf }
 0xc45   :  { %1799 = vmax.xlane.f32.xlu0 %v1798_v45  ;;  %v1792_v15 = vpop.f32.mrb[66].mxu1 }
 0xc46   :  { %v2880_v16 = vpop.f32.mrb[67].mxu1 }
 0xc48   :  { %1931 = vrot.lane.b32.xlu1 %v3553_v19, %s3115_s2 }
 0xc4c   :  { %1929 = vrot.lane.b32.xlu1 %v3564_v26, %s3115_s2 }
 0xc50   :  { %2099 = vrot.lane.b32.xlu1 %v3594_v25, %s3115_s2 }
 0xc5b   :  { %1981 = vrot.lane.b32.xlu0 %v3560_v27, %s3115_s2 }
 0xc5f   :  { %1979 = vrot.lane.b32.xlu0 %v3579_v30, %s3115_s2 }
 0xc63   :  { %2051 = vrot.lane.b32.xlu0 %v3575_v29, %s3115_s2 }
 0xcc4   :  { %v1797_v17 = vpop.xlane.xlu1 %1796 }
 0xcc5   :  { %v1801_v49 = vsub.f32 %v1737_v62, %v1797_v17 }
 0xcc7   :  { %v1803_v8 = vmul.f32 1.442695, %v1801_v49 }
 0xcc8   :  { %v1932_v31 = vpop.permute.xlu1 %1931 }
 0xcc9   :  { %3059 = vpow2.f32 %v1803_v8  ;;  %v1937_v18 = vsel %vm170_vm2, %v1932_v31, 0 }
 0xccc   :  { %v1930_v23 = vpop.permute.xlu1 %1929 }
 0xcd0   :  { %v2100_v58 = vpop.permute.xlu1 %2099 }
 0xcd1   :  { %v2105_v21 = vsel %vm291_vm3, %v2100_v58, 0 }
 0xcd2   :  { %v1800_v28 = vpop.xlane.xlu0 %1799 }
 0xcd3   :  { %v3653_v7 = vpop.eup %3059  ;;  %v1802_v32 = vsub.f32 %v1789_v14, %v1800_v28 }
 0xcd4   :  { %v1815_v34 = vpack.c.bf16 %v3653_v7, %v3653_v7 }
 0xcd5   :  { %v1805_v35 = vmul.f32 1.442695, %v1802_v32 }
 0xcd6   :  { %v1982_v57 = vpop.permute.xlu0 %1981  ;;  %2884 = vmatmul.mubr.msk.bf16.vlgmr.msra.gmra.mrb[40].mxu0 %vm263_vm4, %v1815_v34 }
 0xcd7   :  { %3061 = vpow2.f32 %v1805_v35  ;;  %2894 = vmatpush3.bf16.xpose.msra.mxu0 %v1937_v18  ;;  %2895 = vmatprep.mubr.msk.bf16.mxu0 %vm3113_vm1, %v3112_v5  ;;  %v1987_v39 = vsel %vm170_vm2, %v1982_v57, 0 }
 0xcd8   :  { %2905 = vmatprep.subr.bf16.mxu0 %v3112_v5 }
 0xcda   :  { %v1980_v37 = vpop.permute.xlu0 %1979 }
 0xcde   :  { %v2052_v24 = vpop.permute.xlu0 %2051  ;;  %2896 = vmatmul.mubr.msk.bf16.vlgmr.msra.gmra.mrb[44].mxu0 %vm170_vm2, %v1930_v23 }
 0xcdf   :  { %v2057_v2 = vsel %vm291_vm3, %v2052_v24, 0  ;;  %2907 = vmatprep.mubr.msk.bf16.mxu0 %vm3113_vm1, %v3112_v5 }
 0xce0   :  { %2906 = vmatpush3.bf16.msra.mxu0 %v2057_v2 }
 0xce1   :  { %v3666_v61 = vpop.eup %3061  ;;  %2917 = vmatprep.subr.bf16.mxu0 %v3112_v5 }
 0xce2   :  { %v1816_v38 = vpack.c.bf16 %v3666_v61, %v3666_v61 }
 0xce4   :  { %2890 = vmatmul.mubr.msk.bf16.vlgmr.msra.gmra.mrb[68].mxu1 %vm263_vm4, %v1816_v38 }
 0xce5   :  { %2900 = vmatpush3.bf16.xpose.msra.mxu1 %v1987_v39  ;;  %2901 = vmatprep.mubr.msk.bf16.mxu1 %vm3113_vm1, %v3112_v5 }
 0xce6   :  { %2911 = vmatprep.subr.bf16.mxu1 %v3112_v5 }
 0xcec   :  { %2902 = vmatmul.mubr.msk.bf16.vlgmr.msra.gmra.mrb[72].mxu1 %vm170_vm2, %v1980_v37 }
 0xced   :  { %2912 = vmatpush3.bf16.msra.mxu1 %v2105_v21  ;;  %2913 = vmatprep.mubr.msk.bf16.mxu1 %vm3113_vm1, %v3112_v5  ;;  %v1807_v21 = vsel %vm263_vm4, %v3653_v7, 0.0 }
 0xcee   :  { %2923 = vmatprep.subr.bf16.mxu1 %v3112_v5 }
 0xda9   :  { %v3681_v22 = vpop.f32.mrb[40].mxu0 }
 0xdaa   :  { %v2885_v40 = vpop.f32.mrb[41].mxu0 }
 0xdab   :  { %v1863_v63 = vpop.f32.mrb[42].mxu0 }
 0xdac   :  { %v2886_v41 = vpop.f32.mrb[43].mxu0  ;;  %v1810_v63 = vsel %vm263_vm4, %v3666_v61, 0.0 }
 0xdb1   :  { %v1973_v42 = vpop.f32.mrb[44].mxu0 }
 0xdb2   :  { %v2897_v44 = vpop.f32.mrb[45].mxu0  ;;  %v2029_v46 = vsel %vm263_vm4, %v1973_v42, -inf }
 0xdb3   :  { %2030 = vmax.xlane.f32.xlu1 %v2029_v46  ;;  %v1976_v47 = vpop.f32.mrb[46].mxu0 }
 0xdb4   :  { %v2898_v48 = vpop.f32.mrb[47].mxu0 }
 0xdb7   :  { %v3684_v50 = vpop.f32.mrb[68].mxu1 }
 0xdb8   :  { %v2891_v51 = vpop.f32.mrb[69].mxu1 }
 0xdb9   :  { %v1912_v53 = vpop.f32.mrb[70].mxu1 }
 0xdba   :  { %v2892_v54 = vpop.f32.mrb[71].mxu1 }
 0xdbf   :  { %v2023_v55 = vpop.f32.mrb[72].mxu1 }
 0xdc0   :  { %v2903_v56 = vpop.f32.mrb[73].mxu1  ;;  %v2032_v59 = vsel %vm263_vm4, %v2023_v55, -inf }
 0xdc1   :  { %2033 = vmax.xlane.f32.xlu0 %v2032_v59  ;;  %v2026_v60 = vpop.f32.mrb[74].mxu1 }
 0xdc2   :  { %v2904_v12 = vpop.f32.mrb[75].mxu1 }
 0xdc4   :  { %2163 = vrot.lane.b32.xlu1 %v3553_v19, %s3116_s18 }
 0xdc8   :  { %2161 = vrot.lane.b32.xlu1 %v3564_v26, %s3116_s18 }
 0xdd7   :  { %2213 = vrot.lane.b32.xlu0 %v3560_v27, %s3116_s18 }
 0xddb   :  { %2211 = vrot.lane.b32.xlu0 %v3579_v30, %s3116_s18 }
 0xe40   :  { %v2031_v62 = vpop.xlane.xlu1 %2030 }
 0xe41   :  { %v2035_v0 = vsub.f32 %v1973_v42, %v2031_v62  ;;  %v1584_v62 = vsel %vm263_vm4, %v3620_v52, 0.0 }
 0xe43   :  { %v2037_v1 = vmul.f32 1.442695, %v2035_v0 }
 0xe44   :  { %v2164_v10 = vpop.permute.xlu1 %2163 }
 0xe45   :  { %3063 = vpow2.f32 %v2037_v1  ;;  %v2169_v19 = vsel %vm170_vm2, %v2164_v10, 0 }
 0xe48   :  { %v2162_v27 = vpop.permute.xlu1 %2161 }
 0xe4e   :  { %v2034_v3 = vpop.xlane.xlu0 %2033 }
 0xe4f   :  { %v3064_v6 = vpop.eup %3063  ;;  %v2036_v13 = vsub.f32 %v2023_v55, %v2034_v3  ;;  %v1581_v55 = vsel %vm263_vm4, %v3605_v43, 0.0 }
 0xe50   :  { %v2049_v36 = vpack.c.bf16 %v3064_v6, %v3064_v6  ;;  %v2041_v41 = vsel %vm263_vm4, %v3064_v6, 0.0 }
 0xe51   :  { %v2039_v14 = vmul.f32 1.442695, %v2036_v13 }
 0xe52   :  { %2908 = vmatmul.mubr.msk.bf16.vlgmr.msra.gmra.mrb[48].mxu0 %vm263_vm4, %v2049_v36  ;;  %v2214_v30 = vpop.permute.xlu0 %2213 }
 0xe53   :  { %3065 = vpow2.f32 %v2039_v14  ;;  %2918 = vmatpush3.bf16.xpose.msra.mxu0 %v2169_v19  ;;  %2919 = vmatprep.mubr.msk.bf16.mxu0 %vm3113_vm1, %v3112_v5  ;;  %v2219_v45 = vsel %vm170_vm2, %v2214_v30, 0 }
 0xe54   :  { %2929 = vmatprep.subr.bf16.mxu0 %v3112_v5 }
 0xe56   :  { %v2212_v15 = vpop.permute.xlu0 %2211 }
 0xe5a   :  { %2920 = vmatmul.mubr.msk.bf16.vlgmr.msra.gmra.mrb[52].mxu0 %vm170_vm2, %v2162_v27 }
 0xe5b   :  { %2931 = vmatprep.mubr.msk.bf16.mxu0 %vm3113_vm1, %v3112_v5 }
 0xe5d   :  { %v3066_v26 = vpop.eup %3065 }
 0xe5e   :  { %v2050_v33 = vpack.c.bf16 %v3066_v26, %v3066_v26  ;;  %v2044_v40 = vsel %vm263_vm4, %v3066_v26, 0.0  ;;  %v3016_v26 = vld [vmem:[%s3818_s7 + $0x8] sm:$0xff]  }
 0xe60   :  { %2914 = vmatmul.mubr.msk.bf16.vlgmr.msra.gmra.mrb[76].mxu1 %vm263_vm4, %v2050_v33 }
 0xe61   :  { %2924 = vmatpush3.bf16.xpose.msra.mxu1 %v2219_v45  ;;  %2925 = vmatprep.mubr.msk.bf16.mxu1 %vm3113_vm1, %v3112_v5 }
 0xe62   :  { %2935 = vmatprep.subr.bf16.mxu1 %v3112_v5 }
 0xe68   :  { %2926 = vmatmul.mubr.msk.bf16.vlgmr.msra.gmra.mrb[80].mxu1 %vm170_vm2, %v2212_v15 }
 0xe69   :  { %2937 = vmatprep.mubr.msk.bf16.mxu1 %vm3113_vm1, %v3112_v5 }
 0xf25   :  { %v3711_v16 = vpop.f32.mrb[48].mxu0 }
 0xf26   :  { %v2909_v17 = vpop.f32.mrb[49].mxu0 }
 0xf27   :  { %v2096_v49 = vpop.f32.mrb[50].mxu0 }
 0xf28   :  { %v2910_v8 = vpop.f32.mrb[51].mxu0 }
 0xf2d   :  { %v2205_v28 = vpop.f32.mrb[52].mxu0 }
 0xf2e   :  { %v2921_v31 = vpop.f32.mrb[53].mxu0  ;;  %v2261_v32 = vsel %vm263_vm4, %v2205_v28, -inf }
 0xf2f   :  { %2262 = vmax.xlane.f32.xlu1 %v2261_v32  ;;  %v2208_v34 = vpop.f32.mrb[54].mxu0 }
 0xf30   :  { %v2922_v35 = vpop.f32.mrb[55].mxu0 }
 0xf33   :  { %v2141_v18 = vpop.f32.mrb[76].mxu1 }
 0xf34   :  { %v2915_v57 = vpop.f32.mrb[77].mxu1 }
 0xf35   :  { %v2144_v37 = vpop.f32.mrb[78].mxu1 }
 0xf36   :  { %v2916_v23 = vpop.f32.mrb[79].mxu1 }
 0xf3b   :  { %v2255_v24 = vpop.f32.mrb[80].mxu1 }
 0xf3c   :  { %v2927_v2 = vpop.f32.mrb[81].mxu1  ;;  %v2264_v38 = vsel %vm263_vm4, %v2255_v24, -inf }
 0xf3d   :  { %2265 = vmax.xlane.f32.xlu0 %v2264_v38  ;;  %v2258_v39 = vpop.f32.mrb[82].mxu1  ;;  %v3020_v2 = vld [vmem:[%s3818_s7 + $0x28] sm:$0xff]  }
 0xf3e   :  { %v2928_v58 = vpop.f32.mrb[83].mxu1 }
 0xf40   :  { %2331 = vrot.lane.b32.xlu1 %v3594_v25, %s3116_s18 }
 0xf53   :  { %2283 = vrot.lane.b32.xlu0 %v3575_v29, %s3116_s18 }
 0xf64   :  { %1808 = vadd.xlane.f32.xlu1 %v1807_v21 }
 0xf68   :  { %2045 = vadd.xlane.f32.xlu1 %v2044_v40  ;;  %v3021_v40 = vld [vmem:[%s3818_s7 + $0x30] sm:$0xff]  }
 0xf72   :  { %1811 = vadd.xlane.f32.xlu0 %v1810_v63 }
 0xf76   :  { %2042 = vadd.xlane.f32.xlu0 %v2041_v41 }
 0xfbc   :  { %v2263_v42 = vpop.xlane.xlu1 %2262 }
 0xfbd   :  { %v2267_v44 = vsub.f32 %v2205_v28, %v2263_v42  ;;  %v3022_v42 = vld [vmem:[%s3818_s7 + $0x38] sm:$0xff]  }
 0xfbf   :  { %v2269_v25 = vmul.f32 1.442695, %v2267_v44 }
 0xfc0   :  { %v2332_v46 = vpop.permute.xlu1 %2331 }
 0xfc1   :  { %3067 = vpow2.f32 %v2269_v25  ;;  %v2337_v29 = vsel %vm291_vm3, %v2332_v46, 0 }
 0xfc2   :  { %2936 = vmatpush3.bf16.msra.mxu1 %v2337_v29 }
 0xfca   :  { %v2266_v7 = vpop.xlane.xlu0 %2265 }
 0xfcb   :  { %v3068_v47 = vpop.eup %3067  ;;  %v2268_v48 = vsub.f32 %v2255_v24, %v2266_v7  ;;  %v3019_v24 = vld [vmem:[%s3818_s7 + $0x20] sm:$0xff]  }
 0xfcc   :  { %v2273_v51 = vsel %vm263_vm4, %v3068_v47, 0.0  ;;  %v2281_v56 = vpack.c.bf16 %v3068_v47, %v3068_v47 }
 0xfcd   :  { %v2271_v53 = vmul.f32 1.442695, %v2268_v48  ;;  %2274 = vadd.xlane.f32.xlu0 %v2273_v51 }
 0xfce   :  { %v2284_v61 = vpop.permute.xlu0 %2283 }
 0xfcf   :  { %3069 = vpow2.f32 %v2271_v53  ;;  %v2289_v54 = vsel %vm291_vm3, %v2284_v61, 0 }
 0xfd0   :  { %2930 = vmatpush3.bf16.msra.mxu0 %v2289_v54 }
 0xfd1   :  { %1582 = vadd.xlane.f32.xlu0 %v1581_v55  ;;  %2941 = vmatprep.subr.bf16.mxu0 %v3112_v5 }
 0xfd3   :  { %2932 = vmatmul.mubr.msk.bf16.vlgmr.msra.gmra.mrb[56].mxu0 %vm263_vm4, %v2281_v56  ;;  %v2601_v56 = vld [vmem:[%s3819_s8] ss:$0 sm:$0xff] }
 0xfd4   :  { %2957 = vmatprep.mubr.msk.bf16.mxu0 %vm3113_vm1, %v3112_v5 }
 0xfd9   :  { %v3070_v59 = vpop.eup %3069 }
 0xfda   :  { %v2276_v60 = vsel %vm263_vm4, %v3070_v59, 0.0  ;;  %v2282_v12 = vpack.c.bf16 %v3070_v59, %v3070_v59 }
 0xfdb   :  { %2277 = vadd.xlane.f32.xlu1 %v2276_v60 }
 0xfdc   :  { %2938 = vmatmul.mubr.msk.bf16.vlgmr.msra.gmra.mrb[84].mxu1 %vm263_vm4, %v2282_v12 }
 0xfdf   :  { %1585 = vadd.xlane.f32.xlu1 %v1584_v62 }
 0xff1   :  { %v1809_v43 = vpop.xlane.xlu1 %1808 }
 0xff2   :  { %3071 = vrcp.f32 %v1809_v43 }
 0xff5   :  { %v2046_v0 = vpop.xlane.xlu1 %2045 }
 0xff6   :  { %3073 = vrcp.f32 %v2046_v0 }
 0xffc   :  { %v3072_v1 = vpop.eup %3071 }
 0xffd   :  { %v1915_v3 = vmul.f32 %v3072_v1, %v3681_v22  ;;  %v3015_v22 = vld [vmem:[%s3818_s7] sm:$0xff]  }
 0xffe   :  { %2942 = vmatpush3.bf16.msra.mxu0 %v3015_v22 }
 0xfff   :  { %v1812_v6 = vpop.xlane.xlu0 %1811  ;;  %1919 = vrot.lane.b32.xlu0 %v1915_v3, %s3116_s18  ;;  %2943 = vmatprep.subr.bf16.mxu0 %v3112_v5 }
0x1000   :  { %v3074_v10 = vpop.eup %3073  ;;  %3075 = vrcp.f32 %v1812_v6 }
0x1001   :  { %v2148_v13 = vmul.f32 %v3074_v10, %v2141_v18 }
0x1002   :  { %2944 = vmatpush3.bf16.msra.mxu0 %v3016_v26 }
0x1003   :  { %v2043_v36 = vpop.xlane.xlu0 %2042  ;;  %2153 = vrot.lane.b32.xlu0 %v2148_v13, %s3115_s2  ;;  %2945 = vmatprep.subr.bf16.mxu0 %v3112_v5 }
0x1004   :  { %3077 = vrcp.f32 %v2043_v36 }
0x100a   :  { %v3076_v14 = vpop.eup %3075 }
0x100b   :  { %v1916_v52 = vmul.f32 %v3076_v14, %v3684_v50  ;;  %v3017_v50 = vld [vmem:[%s3818_s7 + $0x10] sm:$0xff]  }
0x100c   :  { %2946 = vmatpush3.bf16.msra.mxu0 %v3017_v50 }
0x100d   :  { %1921 = vrot.lane.b32.xlu1 %v1916_v52, %s3116_s18  ;;  %2947 = vmatprep.subr.bf16.mxu0 %v3112_v5 }
0x100e   :  { %v3078_v19 = vpop.eup %3077 }
0x100f   :  { %v2147_v27 = vmul.f32 %v3078_v19, %v3711_v16 }
0x1011   :  { %2151 = vrot.lane.b32.xlu1 %v2147_v27, %s3115_s2 }
0x105a   :  { %v2275_v30 = vpop.xlane.xlu0 %2274 }
0x105e   :  { %v1583_v33 = vpop.xlane.xlu0 %1582 }
0x105f   :  { %3079 = vrcp.f32 %v1583_v33 }
0x1068   :  { %v2278_v45 = vpop.xlane.xlu1 %2277 }
0x1069   :  { %v3080_v15 = vpop.eup %3079 }
0x106a   :  { %v1685_v16 = vmul.f32 %v3080_v15, %v3635_v4 }
0x106c   :  { %v1687_v17 = vadd.f32 %v1685_v16, %v3557_v20  ;;  %v1586_v49 = vpop.xlane.xlu1 %1585 }
0x106d   :  { %3081 = vrcp.f32 %v1586_v49 }
0x106e   :  { %1689 = vst.msk [vmem:[#allocation2] sm:$0xff] %vm170_vm2, %v1687_v17  ;;  %3083 = vrcp.f32 %v2275_v30 }
0x106f   :  { %3085 = vrcp.f32 %v2278_v45 }
0x1071   :  { %v1920_v8 = vpop.permute.xlu0 %1919 }
0x1072   :  { %v1925_v28 = vadd.f32 %v1920_v8, %v3557_v20 }
0x1074   :  { %1927 = vst.msk [vmem:[#allocation2] sm:$0xff] %vm623_vm5, %v1925_v28 }
0x1075   :  { %v2154_v35 = vpop.permute.xlu0 %2153 }
0x1076   :  { %v2158_v57 = vadd.f32 %v2154_v35, %v3572_v11 }
0x1077   :  { %v3082_v31 = vpop.eup %3081 }
0x1078   :  { %v1686_v32 = vmul.f32 %v3082_v31, %v3638_v9  ;;  %v3018_v9 = vld [vmem:[%s3818_s7 + $0x18] sm:$0xff]   ;;  %v3084_v38 = vpop.eup %3083 }
0x1079   :  { %2948 = vmatpush3.bf16.msra.mxu0 %v3018_v9  ;;  %v3086_v44 = vpop.eup %3085 }
0x107a   :  { %v1688_v34 = vadd.f32 %v1686_v32, %v3572_v11  ;;  %2949 = vmatprep.subr.bf16.mxu0 %v3112_v5 }
0x107c   :  { %1690 = vst.msk [vmem:[#allocation2 + $0x8] sm:$0xff] %vm170_vm2, %v1688_v34 }
0x107d   :  { %2950 = vmatpush3.bf16.msra.mxu0 %v3019_v24 }
0x107e   :  { %2951 = vmatprep.subr.bf16.mxu0 %v3112_v5 }
0x107f   :  { %v1922_v4 = vpop.permute.xlu1 %1921 }
0x1080   :  { %v1926_v18 = vadd.f32 %v1922_v4, %v3572_v11 }
0x1081   :  { %2952 = vmatpush3.bf16.msra.mxu0 %v3020_v2 }
0x1082   :  { %1928 = vst.msk [vmem:[#allocation2 + $0x8] sm:$0xff] %vm623_vm5, %v1926_v18  ;;  %2953 = vmatprep.subr.bf16.mxu0 %v3112_v5 }
0x1083   :  { %2160 = vst.msk [vmem:[#allocation2 + $0x8] sm:$0xff] %vm856_vm6, %v2158_v57  ;;  %v2152_v37 = vpop.permute.xlu1 %2151 }
0x1084   :  { %v2157_v23 = vadd.f32 %v2152_v37, %v3557_v20 }
0x1085   :  { %2954 = vmatpush3.bf16.msra.mxu0 %v3021_v40 }
0x1086   :  { %2159 = vst.msk [vmem:[#allocation2] sm:$0xff] %vm856_vm6, %v2157_v23  ;;  %2955 = vmatprep.subr.bf16.mxu0 %v3112_v5 }
0x1089   :  { %2956 = vmatpush3.bf16.msra.mxu0 %v3022_v42 }
0x10a6   :  { %v2325_v39 = vpop.f32.mrb[56].mxu0 }
0x10a7   :  { %v2379_v58 = vmul.f32 %v3084_v38, %v2325_v39  ;;  %v2933_v21 = vpop.f32.mrb[57].mxu0 }
0x10a8   :  { %v2328_v63 = vpop.f32.mrb[58].mxu0 }
0x10a9   :  { %v2934_v41 = vpop.f32.mrb[59].mxu0  ;;  %2383 = vrot.lane.b32.xlu1 %v2379_v58, %s3114_s17 }
0x10af   :  { %v2373_v25 = vpop.f32.mrb[84].mxu1 }
0x10b0   :  { %v2380_v46 = vmul.f32 %v3086_v44, %v2373_v25  ;;  %v2939_v29 = vpop.f32.mrb[85].mxu1 }
0x10b1   :  { %v2376_v7 = vpop.f32.mrb[86].mxu1 }
0x10b2   :  { %2385 = vrot.lane.b32.xlu0 %v2380_v46, %s3114_s17  ;;  %v2940_v47 = vpop.f32.mrb[87].mxu1  ;;  %s3117_s17 = smov [#allocation3]  }
0x10b3   :  { %s2519_s12 = sshll.u32 %s3117_s17, 4  ;;  %s2520_s12 = int_to_ptr.vmem [resolvable:$true] %s2519_s12 }
0x10b4   :  { %s3087_s13 = scalar_lea.vmem %s2520_s12, 256  ;;  %p3092_p1 = scmp.lt.s32.totalorder %s2520_s12, %s2520_s12 }
0x10b5   :  { %p3088_p0 = scmp.ne.s32.totalorder %s2520_s12, %s3087_s13  ;;  %p3093_p2 = scmp.lt.s32.totalorder %s3087_s13, %s3087_s13 }
0x10b7   :  { %p3094_p3 = por %p3093_p2, %p3092_p1 }
0x10b9   :  { %p3095_p4 = pnand %p3094_p3, %p3088_p0 }
0x111b   :  { %v2384_v48 = vpop.permute.xlu1 %2383 }
0x111c   :  { %v2389_v51 = vadd.f32 %v2384_v48, %v3557_v20 }
0x111e   :  { %2391 = vst.msk [vmem:[#allocation2] sm:$0xff] %vm1089_vm7, %v2389_v51 }
0x1124   :  { %v2386_v53 = vpop.permute.xlu0 %2385 }
0x1125   :  { %v2390_v61 = vadd.f32 %v2386_v53, %v3572_v11  ;;  %v2393_v5 = vld [vmem:[#allocation2] sm:$0xff] }
0x1127   :  { %2392 = vst.msk [vmem:[#allocation2 + $0x8] sm:$0xff] %vm1089_vm7, %v2390_v61 }
0x112e   :  { %v2394_v54 = vld [vmem:[#allocation2 + $0x8] sm:$0xff] }
0x112f   :  { %v2395_v55 = vpack.c.bf16 %v2394_v54, %v2393_v5 }
0x1131   :  { %2958 = vmatmul.mubr.bf16.vlgmr.msra.gmra.mrb[60].mxu0 %v2395_v55 }
0x1204   :  { %v2501_v59 = vpop.f32.mrb[60].mxu0 }
0x1205   :  { %v2502_v60 = vadd.f32 %v2601_v56, %v2501_v59  ;;  %v2959_v12 = vpop.f32.mrb[61].mxu0 }
0x1206   :  { %v2504_v62 = vpop.f32.mrb[62].mxu0 }
0x1207   :  { %v2508_v20 = vmax.f32 %v2502_v60, 0.0  ;;  %v2505_v43 = vadd.f32 %v2601_v56, %v2504_v62  ;;  %v2960_v0 = vpop.f32.mrb[63].mxu0 }
0x1209   :  { %v2510_v11 = vadd.f32 %v2508_v20, %v2393_v5  ;;  %v2509_v1 = vmax.f32 %v2505_v43, 0.0 }
0x120b   :  { %2512 = vst [vmem:[#allocation3] sm:$0xff] %v2510_v11  ;;  %v2511_v3 = vadd.f32 %v2509_v1, %v2394_v54 }
0x120d   :  { %2513 = vst [vmem:[#allocation3 + $0x8] sm:$0xff] %v2511_v3 }
0x120e   :  { %3098 = shalt.err (!%p3095_p4)
}
0x120f   :  { %s3099_s15 = scalar_lea.hbm %s3820_s9, 256 }
0x1210   :  { %p3100_p5 = scmp.ne.s32.totalorder %s3820_s9, %s3099_s15  ;;  %p3103_p6 = scmp.lt.u32.totalorder %s3099_s15, %s3820_s9 }
0x1212   :  { %p3105_p7 = pnand %p3103_p6, %p3100_p5 }
0x1214   :  { %3108 = shalt.err (!%p3105_p7)
}
0x1215   :  { %s3118_s4 = smov 128   ;;  %s3119_s5 = smov 8  }
0x1216   :  { %2525 = dma.vmem_to_hbm [thread:$0]  %s2520_s12, 256, %s3820_s9, [#allocation4], %s3118_s4, %s3118_s4, %s3119_s5  }
0x1217   :  { %3109 = dma.done.wait [#allocation4], 256  }
0x1218   :  { %3110 = vsyncadd [#allocation4], 4294967040 }
0x1219   :  { %2529 = vsyncpa [#allocation4], 1 }

</bundles_post_ra>
